<compile_context>
chip_gen: v6e
topology: v6e:2x2x1
jax: 0.10.0
libtpu: 0.0.40
codegen_flags: <defaults>
</compile_context>

<pallas_src>
import functools

import jax
import jax.numpy as jnp
from jax.experimental import pallas as pl
from jax.experimental.pallas import tpu as pltpu

_EPS = 1e-5  # PyTorch GroupNorm default


# ----------------------------------------------------------------------------
# In-kernel helpers.
# ----------------------------------------------------------------------------
def _mean_hw(v):
    """Mean over axes (1, 2) of (bb, H, W*C), keepdims (chained single-axis)."""
    m = jnp.mean(v, axis=2, keepdims=True)
    return jnp.mean(m, axis=1, keepdims=True)


# ----------------------------------------------------------------------------
# Fused SDBlock kernel: one grid step = `bb` full samples resident in VMEM,
# everything in the lane-dense (bb, H, W*C) layout.
# ----------------------------------------------------------------------------
def _sd_block_kernel(x_ref, gam_ref, bet_ref, wt_ref, bia_ref, o_ref, pad_ref,
                     *, eps):
    bb, H, WC = x_ref.shape
    x = x_ref[...].astype(jnp.float32)                      # (bb, H, W*C)

    # Zero ONLY the 1-row halo of the persistent padded scratch.  Done every
    # step (cheap: two (bb,1,WC) stores) instead of under program_id==0 so it
    # is also correct when the grid is sharded across TensorCores (per-core
    # scratch never sees program_id 0 on the second core).
    zrow = jnp.zeros((bb, 1, WC), pad_ref.dtype)
    pad_ref[:, 0:1, :] = zrow
    pad_ref[:, H + 1:H + 2, :] = zrow

    def stage(v, s, act):
        # --- single-pass GroupNorm (num_groups == 1) with folded gamma/beta.
        mu = _mean_hw(v)                                     # (bb, 1, 1)
        ex2 = _mean_hw(v * v)
        var = jnp.maximum(ex2 - mu * mu, 0.0)                # clamp f32 cancellation
        inv = jax.lax.rsqrt(var + eps)
        g = gam_ref[s].astype(jnp.float32)                   # (1, W*C)
        b = bet_ref[s].astype(jnp.float32)
        scale = g * inv                                      # (bb, 1, W*C)
        shift = b - mu * scale
        vn = v * scale + shift
        if act:
            vn = jnp.maximum(vn, 0.0)

        # --- write GN/ReLU result into the padded-scratch interior (cast to
        # the MXU dtype here; all VPU math above stays f32).
        pad_ref[:, 1:H + 1, :] = vn.astype(pad_ref.dtype)

        # --- 3x3 SAME conv == 3 accumulated lane-dense matmuls (one per ky
        # row).  The kx taps and W-padding are encoded in the block-Toeplitz
        # weights, so no lane concat / relayout is needed; the f32 result
        # accumulates the partial sums.
        y2 = None
        for ky in range(3):
            lhs = pad_ref[:, ky:ky + H, :].reshape(bb * H, WC)
            d = jnp.dot(lhs, wt_ref[s, ky],
                        preferred_element_type=jnp.float32)
            y2 = d if y2 is None else y2 + d
        return y2.reshape(bb, H, WC) + bia_ref[s].astype(jnp.float32)

    h1 = stage(x, 0, True)                 # res_block.in_layers
    h = stage(h1, 1, True) + x             # res_block.out_layers + skip
    out = stage(h, 2, False) + h           # attn + residual (DropPath(0) == id)
    o_ref[...] = out.astype(o_ref.dtype)


# ----------------------------------------------------------------------------
# Wrapper-side weight transform: 3x3 conv -> per-ky block-Toeplitz matrices.
# ----------------------------------------------------------------------------
def _toeplitz_conv_weights(wc, W):
    """wc: (S, 3, 3, C, Co) HWIO per stage -> (S, 3, W*C, W*Co).

    For each ky, the 1-D conv along W (with SAME zero padding) becomes one
    dense matmul in the lane-dense layout: output lane index wo*Co + co,
    input lane index wi*C + ci, block value wc[s, ky, wi - wo + 1, ci, co]
    when |wi - wo| <= 1, else zero (zero columns implement the W padding).
    """
    S, KH, KW, C, Co = wc.shape
    wi = jnp.arange(W)[:, None]
    wo = jnp.arange(W)[None, :]
    kx = wi - wo + (KW // 2)
    valid = (kx >= 0) & (kx < KW)
    kxc = jnp.clip(kx, 0, KW - 1)
    blocks = wc[:, :, kxc]                                          # (S,KH,W,W,C,Co)
    blocks = blocks * valid[None, None, :, :, None, None].astype(wc.dtype)
    blocks = jnp.transpose(blocks, (0, 1, 2, 4, 3, 5))              # (S,KH,W,C,W,Co)
    return blocks.reshape(S, KH, W * C, W * Co)


# ----------------------------------------------------------------------------
# Public wrappers.
# ----------------------------------------------------------------------------
def sd_block_forward_nhwc(x_nhwc, p, *, num_groups=1, batch_block=1,
                          mxu_dtype=jnp.bfloat16):
    """x_nhwc: (B, H, W, C) -> (B, H, W, C). Single fused pallas_call."""
    B, H, W, C = x_nhwc.shape
    assert num_groups == 1, (
        "TODO(synk): num_groups > 1 needs grouped stats in the (W*C) layout")
    WC = W * C
    assert WC <= 512, (
        "TODO(synk): large W*C needs the im2col + H-tiled path")

    # Cap batch_block so the grid always keeps >= 2 steps (one per TensorCore
    # on v7x megacore, and a next step for the pipeline to prefetch).
    bb = max(1, min(batch_block, B if B < 2 else B // 2))
    while B % bb:
        bb -= 1

    # Lane-dense view: (B, H, W*C) so block loads/stores are full-width.
    x_d = x_nhwc.reshape(B, H, WC)

    # Per-channel params tiled to the dense (w*C + ci) lane index (f32; used
    # on the VPU).  Conv weights become block-Toeplitz matrices in mxu_dtype.
    gam = jnp.tile(jnp.stack([p["gn1_g"], p["gn2_g"], p["gn3_g"]]),
                   (1, W)).reshape(3, 1, WC).astype(jnp.float32)
    bet = jnp.tile(jnp.stack([p["gn1_b"], p["gn2_b"], p["gn3_b"]]),
                   (1, W)).reshape(3, 1, WC).astype(jnp.float32)
    bia = jnp.tile(jnp.stack([p["b1"], p["b2"], p["b3"]]),
                   (1, W)).reshape(3, 1, WC).astype(jnp.float32)
    wc = jnp.stack([p["w1"], p["w2"], p["w3"]]).reshape(3, 3, 3, C, C)
    wt = _toeplitz_conv_weights(wc, W).astype(mxu_dtype)            # (3,3,WC,WC)

    # Explicit VMEM budget from the per-step live set (+ headroom), capped at
    # the v7x physical 64 MiB; floor keeps comfortable slack on v5e (16 MiB
    # scoped default).
    f32b = 4
    wbytes = jnp.dtype(mxu_dtype).itemsize
    blk = bb * H * WC * f32b
    live = (4 * blk                                   # double-buffered in/out blocks
            + 2 * wt.size * wbytes                    # Toeplitz weights
            + 2 * (gam.size + bet.size + bia.size) * f32b
            + bb * (H + 2) * WC * wbytes              # padded scratch
            + 8 * blk)                                # f32 intermediates headroom
    vmem_limit = int(max(8 << 20, min(int(1.5 * live), 64 << 20)))

    kernel = functools.partial(_sd_block_kernel, eps=_EPS)

    out_d = pl.pallas_call(
        kernel,
        out_shape=jax.ShapeDtypeStruct((B, H, WC), x_nhwc.dtype),
        grid_spec=pltpu.PrefetchScalarGridSpec(
            num_scalar_prefetch=0,
            grid=(B // bb,),
            in_specs=[
                pl.BlockSpec((bb, H, WC), lambda b: (b, 0, 0)),
                pl.BlockSpec((3, 1, WC), lambda b: (0, 0, 0)),
                pl.BlockSpec((3, 1, WC), lambda b: (0, 0, 0)),
                pl.BlockSpec((3, 3, WC, WC), lambda b: (0, 0, 0, 0)),
                pl.BlockSpec((3, 1, WC), lambda b: (0, 0, 0)),
            ],
            out_specs=pl.BlockSpec((bb, H, WC), lambda b: (b, 0, 0)),
            scratch_shapes=[pltpu.VMEM((bb, H + 2, WC), mxu_dtype)],
        ),
        compiler_params=pltpu.CompilerParams(
            dimension_semantics=("parallel",),
            vmem_limit_bytes=vmem_limit),
    )(x_d, gam, bet, wt, bia)

    return out_d.reshape(B, H, W, C)


def sd_block_forward(x_nchw, p, *, num_groups=1, batch_block=1,
                     mxu_dtype=jnp.bfloat16):
    """PyTorch-parity entry point: NCHW in / NCHW out.

    NOTE: prefer sd_block_forward_nhwc on the hot path — these transposes are
    separate XLA ops that round-trip the tensor through HBM.
    """
    x = jnp.transpose(x_nchw, (0, 2, 3, 1))                  # NCHW -> NHWC
    out = sd_block_forward_nhwc(x, p, num_groups=num_groups,
                                batch_block=batch_block, mxu_dtype=mxu_dtype)
    return jnp.transpose(out, (0, 3, 1, 2))                  # NHWC -> NCHW


# ----------------------------------------------------------------------------
# Deterministic parameter init (synthetic; shapes follow the module __init__).
# ----------------------------------------------------------------------------
def init_params(key, c):
    ks = jax.random.split(key, 9)
    scale = 1.0 / (3.0 * (float(c) ** 0.5))

    def conv_w(k):
        return (jax.random.normal(k, (3, 3, c, c), jnp.float32) * scale
                ).reshape(9, c, c)                           # HWIO -> (9, Cin, Cout)

    def vec(k, s=0.02):
        return jax.random.normal(k, (c,), jnp.float32) * s

    return dict(
        gn1_g=1.0 + vec(ks[0], 0.1), gn1_b=vec(ks[1], 0.1),
        w1=conv_w(ks[2]), b1=vec(ks[3]),
        gn2_g=1.0 + vec(ks[4], 0.1), gn2_b=vec(ks[5], 0.1),
        w2=conv_w(ks[6]), b2=vec(ks[7]),
        gn3_g=jnp.ones((c,), jnp.float32), gn3_b=jnp.zeros((c,), jnp.float32),
        w3=conv_w(ks[8]), b3=jnp.zeros((c,), jnp.float32),
    )


# ----------------------------------------------------------------------------
# Pure-JAX reference for correctness checking.
# ----------------------------------------------------------------------------
def _ref_stage(x, gamma, beta, w9, bias, act, residual=None, num_groups=1,
               eps=_EPS):
    B, H, W, C = x.shape
    cout = w9.shape[-1]
    xg = x.reshape(B, H, W, num_groups, C // num_groups)
    mu = xg.mean(axis=(1, 2, 4), keepdims=True)
    var = jnp.square(xg - mu).mean(axis=(1, 2, 4), keepdims=True)
    xn = ((xg - mu) * jax.lax.rsqrt(var + eps)).reshape(B, H, W, C)
    xn = xn * gamma.reshape(1, 1, 1, C) + beta.reshape(1, 1, 1, C)
    if act == "relu":
        xn = jnp.maximum(xn, 0.0)
    w = w9.reshape(3, 3, C, cout)
    y = jax.lax.conv_general_dilated(
        xn, w, (1, 1), "SAME",
        dimension_numbers=("NHWC", "HWIO", "NHWC")) + bias.reshape(1, 1, 1, cout)
    if residual is not None:
        y = y + residual
    return y


def _ref_forward(x_nchw, p, num_groups=1):
    x = jnp.transpose(x_nchw, (0, 2, 3, 1))
    h1 = _ref_stage(x, p["gn1_g"], p["gn1_b"], p["w1"], p["b1"], "relu",
                    num_groups=num_groups)
    h = _ref_stage(h1, p["gn2_g"], p["gn2_b"], p["w2"], p["b2"], "relu",
                   residual=x, num_groups=num_groups)
    out = _ref_stage(h, p["gn3_g"], p["gn3_b"], p["w3"], p["b3"], "none",
                     residual=h, num_groups=num_groups)
    return jnp.transpose(out, (0, 3, 1, 2))


if __name__ == "__main__":
    key = jax.random.PRNGKey(0)
    k_x, k_p = jax.random.split(key)

    B, C, H, W = 2, 8, 16, 16          # in_channels == out_channels, num_groups=1
    x = jax.random.normal(k_x, (B, C, H, W), jnp.float32)
    params = init_params(k_p, C)
    ref = _ref_forward(x, params, num_groups=1)

    # f32 MXU path: tight correctness check.
    out = jax.block_until_ready(
        sd_block_forward(x, params, mxu_dtype=jnp.float32))
    assert out.shape == (B, C, H, W) and out.dtype == jnp.float32
    assert jnp.allclose(out, ref, atol=5e-4, rtol=5e-4), \
        f"f32 max abs err {float(jnp.max(jnp.abs(out - ref)))}"

    # bf16 MXU path (production recommendation on v5e/v6e/v7x): loose check.
    out_bf = jax.block_until_ready(
        sd_block_forward(x, params, mxu_dtype=jnp.bfloat16))
    assert jnp.allclose(out_bf, ref, atol=1e-1, rtol=1e-1), \
        f"bf16 max abs err {float(jnp.max(jnp.abs(out_bf - ref)))}"

    print("KERNEL_OK")
</pallas_src>

<mosaic_0001>
module attributes {stable_mosaic.version = 11 : i64} {
  func.func @_sd_block_kernel(%arg0: i32, %arg1: memref<1x16x128xf32, #tpu.memory_space<vmem>>, %arg2: memref<3x1x128xf32, #tpu.memory_space<vmem>>, %arg3: memref<3x1x128xf32, #tpu.memory_space<vmem>>, %arg4: memref<3x3x128x128xf32, #tpu.memory_space<vmem>>, %arg5: memref<3x1x128xf32, #tpu.memory_space<vmem>>, %arg6: memref<1x16x128xf32, #tpu.memory_space<vmem>>, %arg7: memref<1x18x128xf32, #tpu.memory_space<vmem>>) attributes {dimension_semantics = [#tpu.dimension_semantics<parallel>], iteration_bounds = array<i64: 2>, scalar_prefetch = 0 : i64, scratch_operands = 1 : i64, tpu.core_type = #tpu.core_type<tc>, window_params = [{transform_indices = @transform_0, window_bounds = array<i64: 1, 16, 128>}, {pipeline_mode = #tpu.pipeline_mode<synchronous>, transform_indices = @transform_1, window_bounds = array<i64: 3, 1, 128>}, {pipeline_mode = #tpu.pipeline_mode<synchronous>, transform_indices = @transform_2, window_bounds = array<i64: 3, 1, 128>}, {pipeline_mode = #tpu.pipeline_mode<synchronous>, transform_indices = @transform_3, window_bounds = array<i64: 3, 3, 128, 128>}, {pipeline_mode = #tpu.pipeline_mode<synchronous>, transform_indices = @transform_4, window_bounds = array<i64: 3, 1, 128>}, {transform_indices = @transform_5, window_bounds = array<i64: 1, 16, 128>}]} {
    %c0 = arith.constant 0 : index
    %c0_0 = arith.constant 0 : index
    %c0_1 = arith.constant 0 : index
    %0 = vector.load %arg1[%c0, %c0_0, %c0_1] : memref<1x16x128xf32, #tpu.memory_space<vmem>>, vector<1x16x128xf32>
    %cst = arith.constant 0.000000e+00 : f32
    %1 = vector.broadcast %cst : f32 to vector<1x1x128xf32>
    %c0_2 = arith.constant 0 : index
    %c0_3 = arith.constant 0 : index
    %c0_4 = arith.constant 0 : index
    %2 = vector.load %arg7[%c0_2, %c0_3, %c0_4] : memref<1x18x128xf32, #tpu.memory_space<vmem>>, vector<1x1x128xf32>
    tpu.vector_store %arg7[%c0_2, %c0_3, %c0_4], %1 {strides = array<i32>} : memref<1x18x128xf32, #tpu.memory_space<vmem>>, vector<1x1x128xf32>,
    %c0_5 = arith.constant 0 : index
    %c17 = arith.constant 17 : index
    %c0_6 = arith.constant 0 : index
    %3 = vector.load %arg7[%c0_5, %c17, %c0_6] : memref<1x18x128xf32, #tpu.memory_space<vmem>>, vector<1x1x128xf32>
    tpu.vector_store %arg7[%c0_5, %c17, %c0_6], %1 {strides = array<i32>} : memref<1x18x128xf32, #tpu.memory_space<vmem>>, vector<1x1x128xf32>,
    %cst_7 = arith.constant dense<0.000000e+00> : vector<1x16xf32>
    %4 = vector.multi_reduction <add>, %0, %cst_7 [2] : vector<1x16x128xf32> to vector<1x16xf32>
    %5 = vector.shape_cast %4 : vector<1x16xf32> to vector<1x16x1xf32>
    %cst_8 = arith.constant 1.280000e+02 : f32
    %6 = vector.broadcast %cst_8 : f32 to vector<1x16x1xf32>
    %7 = arith.divf %5, %6 : vector<1x16x1xf32>
    %cst_9 = arith.constant dense<0.000000e+00> : vector<1x1xf32>
    %8 = vector.multi_reduction <add>, %7, %cst_9 [1] : vector<1x16x1xf32> to vector<1x1xf32>
    %9 = vector.shape_cast %8 : vector<1x1xf32> to vector<1x1x1xf32>
    %cst_10 = arith.constant 1.600000e+01 : f32
    %10 = vector.broadcast %cst_10 : f32 to vector<1x1x1xf32>
    %11 = arith.divf %9, %10 : vector<1x1x1xf32>
    %12 = arith.mulf %0, %0 : vector<1x16x128xf32>
    %cst_11 = arith.constant dense<0.000000e+00> : vector<1x16xf32>
    %13 = vector.multi_reduction <add>, %12, %cst_11 [2] : vector<1x16x128xf32> to vector<1x16xf32>
    %14 = vector.shape_cast %13 : vector<1x16xf32> to vector<1x16x1xf32>
    %cst_12 = arith.constant 1.280000e+02 : f32
    %15 = vector.broadcast %cst_12 : f32 to vector<1x16x1xf32>
    %16 = arith.divf %14, %15 : vector<1x16x1xf32>
    %cst_13 = arith.constant dense<0.000000e+00> : vector<1x1xf32>
    %17 = vector.multi_reduction <add>, %16, %cst_13 [1] : vector<1x16x1xf32> to vector<1x1xf32>
    %18 = vector.shape_cast %17 : vector<1x1xf32> to vector<1x1x1xf32>
    %cst_14 = arith.constant 1.600000e+01 : f32
    %19 = vector.broadcast %cst_14 : f32 to vector<1x1x1xf32>
    %20 = arith.divf %18, %19 : vector<1x1x1xf32>
    %21 = arith.mulf %11, %11 : vector<1x1x1xf32>
    %22 = arith.subf %20, %21 : vector<1x1x1xf32>
    %cst_15 = arith.constant 0.000000e+00 : f32
    %23 = vector.broadcast %cst_15 : f32 to vector<1x1x1xf32>
    %24 = arith.maximumf %22, %23 : vector<1x1x1xf32>
    %cst_16 = arith.constant 9.99999974E-6 : f32
    %25 = vector.broadcast %cst_16 : f32 to vector<1x1x1xf32>
    %26 = arith.addf %24, %25 : vector<1x1x1xf32>
    %27 = math.rsqrt %26 : vector<1x1x1xf32>
    %c0_17 = arith.constant 0 : index
    %c0_18 = arith.constant 0 : index
    %c0_19 = arith.constant 0 : index
    %28 = vector.load %arg2[%c0_17, %c0_18, %c0_19] : memref<3x1x128xf32, #tpu.memory_space<vmem>>, vector<1x1x128xf32>
    %29 = vector.shape_cast %28 : vector<1x1x128xf32> to vector<1x128xf32>
    %c0_20 = arith.constant 0 : index
    %c0_21 = arith.constant 0 : index
    %c0_22 = arith.constant 0 : index
    %30 = vector.load %arg3[%c0_20, %c0_21, %c0_22] : memref<3x1x128xf32, #tpu.memory_space<vmem>>, vector<1x1x128xf32>
    %31 = vector.shape_cast %30 : vector<1x1x128xf32> to vector<1x128xf32>
    %32 = vector.shape_cast %29 : vector<1x128xf32> to vector<1x1x128xf32>
    %33 = vector.broadcast %27 : vector<1x1x1xf32> to vector<1x1x128xf32>
    %34 = arith.mulf %32, %33 : vector<1x1x128xf32>
    %35 = vector.broadcast %11 : vector<1x1x1xf32> to vector<1x1x128xf32>
    %36 = arith.mulf %35, %34 : vector<1x1x128xf32>
    %37 = vector.shape_cast %31 : vector<1x128xf32> to vector<1x1x128xf32>
    %38 = arith.subf %37, %36 : vector<1x1x128xf32>
    %39 = vector.broadcast %34 : vector<1x1x128xf32> to vector<1x16x128xf32>
    %40 = arith.mulf %0, %39 : vector<1x16x128xf32>
    %41 = vector.broadcast %38 : vector<1x1x128xf32> to vector<1x16x128xf32>
    %42 = arith.addf %40, %41 : vector<1x16x128xf32>
    %cst_23 = arith.constant 0.000000e+00 : f32
    %43 = vector.broadcast %cst_23 : f32 to vector<1x16x128xf32>
    %44 = arith.maximumf %42, %43 : vector<1x16x128xf32>
    %c0_24 = arith.constant 0 : index
    %c1 = arith.constant 1 : index
    %c0_25 = arith.constant 0 : index
    %45 = vector.load %arg7[%c0_24, %c1, %c0_25] : memref<1x18x128xf32, #tpu.memory_space<vmem>>, vector<1x16x128xf32>
    tpu.vector_store %arg7[%c0_24, %c1, %c0_25], %44 {strides = array<i32>} : memref<1x18x128xf32, #tpu.memory_space<vmem>>, vector<1x16x128xf32>,
    %c0_26 = arith.constant 0 : index
    %c0_27 = arith.constant 0 : index
    %c0_28 = arith.constant 0 : index
    %46 = vector.load %arg7[%c0_26, %c0_27, %c0_28] : memref<1x18x128xf32, #tpu.memory_space<vmem>>, vector<1x16x128xf32>
    %47 = vector.shape_cast %46 : vector<1x16x128xf32> to vector<16x128xf32>
    %c0_29 = arith.constant 0 : index
    %c0_30 = arith.constant 0 : index
    %c0_31 = arith.constant 0 : index
    %c0_32 = arith.constant 0 : index
    %48 = vector.load %arg4[%c0_29, %c0_30, %c0_31, %c0_32] : memref<3x3x128x128xf32, #tpu.memory_space<vmem>>, vector<1x1x128x128xf32>
    %49 = vector.shape_cast %48 : vector<1x1x128x128xf32> to vector<128x128xf32>
    %cst_33 = arith.constant dense<0.000000e+00> : vector<16x128xf32>
    %50 = tpu.matmul %47, %49, %cst_33 {dimension_numbers = #tpu.dot_dimension_numbers<[1], [0], [0], [1], [0, 0, 1, 1], [], []>} : vector<16x128xf32>, vector<128x128xf32>, vector<16x128xf32> -> vector<16x128xf32>
    %c0_34 = arith.constant 0 : index
    %c1_35 = arith.constant 1 : index
    %c0_36 = arith.constant 0 : index
    %51 = vector.load %arg7[%c0_34, %c1_35, %c0_36] : memref<1x18x128xf32, #tpu.memory_space<vmem>>, vector<1x16x128xf32>
    %52 = vector.shape_cast %51 : vector<1x16x128xf32> to vector<16x128xf32>
    %c0_37 = arith.constant 0 : index
    %c1_38 = arith.constant 1 : index
    %c0_39 = arith.constant 0 : index
    %c0_40 = arith.constant 0 : index
    %53 = vector.load %arg4[%c0_37, %c1_38, %c0_39, %c0_40] : memref<3x3x128x128xf32, #tpu.memory_space<vmem>>, vector<1x1x128x128xf32>
    %54 = vector.shape_cast %53 : vector<1x1x128x128xf32> to vector<128x128xf32>
    %cst_41 = arith.constant dense<0.000000e+00> : vector<16x128xf32>
    %55 = tpu.matmul %52, %54, %cst_41 {dimension_numbers = #tpu.dot_dimension_numbers<[1], [0], [0], [1], [0, 0, 1, 1], [], []>} : vector<16x128xf32>, vector<128x128xf32>, vector<16x128xf32> -> vector<16x128xf32>
    %56 = arith.addf %50, %55 : vector<16x128xf32>
    %c0_42 = arith.constant 0 : index
    %c2 = arith.constant 2 : index
    %c0_43 = arith.constant 0 : index
    %57 = vector.load %arg7[%c0_42, %c2, %c0_43] : memref<1x18x128xf32, #tpu.memory_space<vmem>>, vector<1x16x128xf32>
    %58 = vector.shape_cast %57 : vector<1x16x128xf32> to vector<16x128xf32>
    %c0_44 = arith.constant 0 : index
    %c2_45 = arith.constant 2 : index
    %c0_46 = arith.constant 0 : index
    %c0_47 = arith.constant 0 : index
    %59 = vector.load %arg4[%c0_44, %c2_45, %c0_46, %c0_47] : memref<3x3x128x128xf32, #tpu.memory_space<vmem>>, vector<1x1x128x128xf32>
    %60 = vector.shape_cast %59 : vector<1x1x128x128xf32> to vector<128x128xf32>
    %cst_48 = arith.constant dense<0.000000e+00> : vector<16x128xf32>
    %61 = tpu.matmul %58, %60, %cst_48 {dimension_numbers = #tpu.dot_dimension_numbers<[1], [0], [0], [1], [0, 0, 1, 1], [], []>} : vector<16x128xf32>, vector<128x128xf32>, vector<16x128xf32> -> vector<16x128xf32>
    %62 = arith.addf %56, %61 : vector<16x128xf32>
    %63 = vector.shape_cast %62 : vector<16x128xf32> to vector<1x16x128xf32>
    %c0_49 = arith.constant 0 : index
    %c0_50 = arith.constant 0 : index
    %c0_51 = arith.constant 0 : index
    %64 = vector.load %arg5[%c0_49, %c0_50, %c0_51] : memref<3x1x128xf32, #tpu.memory_space<vmem>>, vector<1x1x128xf32>
    %65 = vector.shape_cast %64 : vector<1x1x128xf32> to vector<1x128xf32>
    %66 = vector.shape_cast %65 : vector<1x128xf32> to vector<1x1x128xf32>
    %67 = vector.broadcast %66 : vector<1x1x128xf32> to vector<1x16x128xf32>
    %68 = arith.addf %63, %67 : vector<1x16x128xf32>
    %cst_52 = arith.constant dense<0.000000e+00> : vector<1x16xf32>
    %69 = vector.multi_reduction <add>, %68, %cst_52 [2] : vector<1x16x128xf32> to vector<1x16xf32>
    %70 = vector.shape_cast %69 : vector<1x16xf32> to vector<1x16x1xf32>
    %cst_53 = arith.constant 1.280000e+02 : f32
    %71 = vector.broadcast %cst_53 : f32 to vector<1x16x1xf32>
    %72 = arith.divf %70, %71 : vector<1x16x1xf32>
    %cst_54 = arith.constant dense<0.000000e+00> : vector<1x1xf32>
    %73 = vector.multi_reduction <add>, %72, %cst_54 [1] : vector<1x16x1xf32> to vector<1x1xf32>
    %74 = vector.shape_cast %73 : vector<1x1xf32> to vector<1x1x1xf32>
    %cst_55 = arith.constant 1.600000e+01 : f32
    %75 = vector.broadcast %cst_55 : f32 to vector<1x1x1xf32>
    %76 = arith.divf %74, %75 : vector<1x1x1xf32>
    %77 = arith.mulf %68, %68 : vector<1x16x128xf32>
    %cst_56 = arith.constant dense<0.000000e+00> : vector<1x16xf32>
    %78 = vector.multi_reduction <add>, %77, %cst_56 [2] : vector<1x16x128xf32> to vector<1x16xf32>
    %79 = vector.shape_cast %78 : vector<1x16xf32> to vector<1x16x1xf32>
    %cst_57 = arith.constant 1.280000e+02 : f32
    %80 = vector.broadcast %cst_57 : f32 to vector<1x16x1xf32>
    %81 = arith.divf %79, %80 : vector<1x16x1xf32>
    %cst_58 = arith.constant dense<0.000000e+00> : vector<1x1xf32>
    %82 = vector.multi_reduction <add>, %81, %cst_58 [1] : vector<1x16x1xf32> to vector<1x1xf32>
    %83 = vector.shape_cast %82 : vector<1x1xf32> to vector<1x1x1xf32>
    %cst_59 = arith.constant 1.600000e+01 : f32
    %84 = vector.broadcast %cst_59 : f32 to vector<1x1x1xf32>
    %85 = arith.divf %83, %84 : vector<1x1x1xf32>
    %86 = arith.mulf %76, %76 : vector<1x1x1xf32>
    %87 = arith.subf %85, %86 : vector<1x1x1xf32>
    %cst_60 = arith.constant 0.000000e+00 : f32
    %88 = vector.broadcast %cst_60 : f32 to vector<1x1x1xf32>
    %89 = arith.maximumf %87, %88 : vector<1x1x1xf32>
    %cst_61 = arith.constant 9.99999974E-6 : f32
    %90 = vector.broadcast %cst_61 : f32 to vector<1x1x1xf32>
    %91 = arith.addf %89, %90 : vector<1x1x1xf32>
    %92 = math.rsqrt %91 : vector<1x1x1xf32>
    %c1_62 = arith.constant 1 : index
    %c0_63 = arith.constant 0 : index
    %c0_64 = arith.constant 0 : index
    %93 = vector.load %arg2[%c1_62, %c0_63, %c0_64] : memref<3x1x128xf32, #tpu.memory_space<vmem>>, vector<1x1x128xf32>
    %94 = vector.shape_cast %93 : vector<1x1x128xf32> to vector<1x128xf32>
    %c1_65 = arith.constant 1 : index
    %c0_66 = arith.constant 0 : index
    %c0_67 = arith.constant 0 : index
    %95 = vector.load %arg3[%c1_65, %c0_66, %c0_67] : memref<3x1x128xf32, #tpu.memory_space<vmem>>, vector<1x1x128xf32>
    %96 = vector.shape_cast %95 : vector<1x1x128xf32> to vector<1x128xf32>
    %97 = vector.shape_cast %94 : vector<1x128xf32> to vector<1x1x128xf32>
    %98 = vector.broadcast %92 : vector<1x1x1xf32> to vector<1x1x128xf32>
    %99 = arith.mulf %97, %98 : vector<1x1x128xf32>
    %100 = vector.broadcast %76 : vector<1x1x1xf32> to vector<1x1x128xf32>
    %101 = arith.mulf %100, %99 : vector<1x1x128xf32>
    %102 = vector.shape_cast %96 : vector<1x128xf32> to vector<1x1x128xf32>
    %103 = arith.subf %102, %101 : vector<1x1x128xf32>
    %104 = vector.broadcast %99 : vector<1x1x128xf32> to vector<1x16x128xf32>
    %105 = arith.mulf %68, %104 : vector<1x16x128xf32>
    %106 = vector.broadcast %103 : vector<1x1x128xf32> to vector<1x16x128xf32>
    %107 = arith.addf %105, %106 : vector<1x16x128xf32>
    %cst_68 = arith.constant 0.000000e+00 : f32
    %108 = vector.broadcast %cst_68 : f32 to vector<1x16x128xf32>
    %109 = arith.maximumf %107, %108 : vector<1x16x128xf32>
    %c0_69 = arith.constant 0 : index
    %c1_70 = arith.constant 1 : index
    %c0_71 = arith.constant 0 : index
    %110 = vector.load %arg7[%c0_69, %c1_70, %c0_71] : memref<1x18x128xf32, #tpu.memory_space<vmem>>, vector<1x16x128xf32>
    tpu.vector_store %arg7[%c0_69, %c1_70, %c0_71], %109 {strides = array<i32>} : memref<1x18x128xf32, #tpu.memory_space<vmem>>, vector<1x16x128xf32>,
    %c0_72 = arith.constant 0 : index
    %c0_73 = arith.constant 0 : index
    %c0_74 = arith.constant 0 : index
    %111 = vector.load %arg7[%c0_72, %c0_73, %c0_74] : memref<1x18x128xf32, #tpu.memory_space<vmem>>, vector<1x16x128xf32>
    %112 = vector.shape_cast %111 : vector<1x16x128xf32> to vector<16x128xf32>
    %c1_75 = arith.constant 1 : index
    %c0_76 = arith.constant 0 : index
    %c0_77 = arith.constant 0 : index
    %c0_78 = arith.constant 0 : index
    %113 = vector.load %arg4[%c1_75, %c0_76, %c0_77, %c0_78] : memref<3x3x128x128xf32, #tpu.memory_space<vmem>>, vector<1x1x128x128xf32>
    %114 = vector.shape_cast %113 : vector<1x1x128x128xf32> to vector<128x128xf32>
    %cst_79 = arith.constant dense<0.000000e+00> : vector<16x128xf32>
    %115 = tpu.matmul %112, %114, %cst_79 {dimension_numbers = #tpu.dot_dimension_numbers<[1], [0], [0], [1], [0, 0, 1, 1], [], []>} : vector<16x128xf32>, vector<128x128xf32>, vector<16x128xf32> -> vector<16x128xf32>
    %c0_80 = arith.constant 0 : index
    %c1_81 = arith.constant 1 : index
    %c0_82 = arith.constant 0 : index
    %116 = vector.load %arg7[%c0_80, %c1_81, %c0_82] : memref<1x18x128xf32, #tpu.memory_space<vmem>>, vector<1x16x128xf32>
    %117 = vector.shape_cast %116 : vector<1x16x128xf32> to vector<16x128xf32>
    %c1_83 = arith.constant 1 : index
    %c1_84 = arith.constant 1 : index
    %c0_85 = arith.constant 0 : index
    %c0_86 = arith.constant 0 : index
    %118 = vector.load %arg4[%c1_83, %c1_84, %c0_85, %c0_86] : memref<3x3x128x128xf32, #tpu.memory_space<vmem>>, vector<1x1x128x128xf32>
    %119 = vector.shape_cast %118 : vector<1x1x128x128xf32> to vector<128x128xf32>
    %cst_87 = arith.constant dense<0.000000e+00> : vector<16x128xf32>
    %120 = tpu.matmul %117, %119, %cst_87 {dimension_numbers = #tpu.dot_dimension_numbers<[1], [0], [0], [1], [0, 0, 1, 1], [], []>} : vector<16x128xf32>, vector<128x128xf32>, vector<16x128xf32> -> vector<16x128xf32>
    %121 = arith.addf %115, %120 : vector<16x128xf32>
    %c0_88 = arith.constant 0 : index
    %c2_89 = arith.constant 2 : index
    %c0_90 = arith.constant 0 : index
    %122 = vector.load %arg7[%c0_88, %c2_89, %c0_90] : memref<1x18x128xf32, #tpu.memory_space<vmem>>, vector<1x16x128xf32>
    %123 = vector.shape_cast %122 : vector<1x16x128xf32> to vector<16x128xf32>
    %c1_91 = arith.constant 1 : index
    %c2_92 = arith.constant 2 : index
    %c0_93 = arith.constant 0 : index
    %c0_94 = arith.constant 0 : index
    %124 = vector.load %arg4[%c1_91, %c2_92, %c0_93, %c0_94] : memref<3x3x128x128xf32, #tpu.memory_space<vmem>>, vector<1x1x128x128xf32>
    %125 = vector.shape_cast %124 : vector<1x1x128x128xf32> to vector<128x128xf32>
    %cst_95 = arith.constant dense<0.000000e+00> : vector<16x128xf32>
    %126 = tpu.matmul %123, %125, %cst_95 {dimension_numbers = #tpu.dot_dimension_numbers<[1], [0], [0], [1], [0, 0, 1, 1], [], []>} : vector<16x128xf32>, vector<128x128xf32>, vector<16x128xf32> -> vector<16x128xf32>
    %127 = arith.addf %121, %126 : vector<16x128xf32>
    %128 = vector.shape_cast %127 : vector<16x128xf32> to vector<1x16x128xf32>
    %c1_96 = arith.constant 1 : index
    %c0_97 = arith.constant 0 : index
    %c0_98 = arith.constant 0 : index
    %129 = vector.load %arg5[%c1_96, %c0_97, %c0_98] : memref<3x1x128xf32, #tpu.memory_space<vmem>>, vector<1x1x128xf32>
    %130 = vector.shape_cast %129 : vector<1x1x128xf32> to vector<1x128xf32>
    %131 = vector.shape_cast %130 : vector<1x128xf32> to vector<1x1x128xf32>
    %132 = vector.broadcast %131 : vector<1x1x128xf32> to vector<1x16x128xf32>
    %133 = arith.addf %128, %132 : vector<1x16x128xf32>
    %134 = arith.addf %133, %0 : vector<1x16x128xf32>
    %cst_99 = arith.constant dense<0.000000e+00> : vector<1x16xf32>
    %135 = vector.multi_reduction <add>, %134, %cst_99 [2] : vector<1x16x128xf32> to vector<1x16xf32>
    %136 = vector.shape_cast %135 : vector<1x16xf32> to vector<1x16x1xf32>
    %cst_100 = arith.constant 1.280000e+02 : f32
    %137 = vector.broadcast %cst_100 : f32 to vector<1x16x1xf32>
    %138 = arith.divf %136, %137 : vector<1x16x1xf32>
    %cst_101 = arith.constant dense<0.000000e+00> : vector<1x1xf32>
    %139 = vector.multi_reduction <add>, %138, %cst_101 [1] : vector<1x16x1xf32> to vector<1x1xf32>
    %140 = vector.shape_cast %139 : vector<1x1xf32> to vector<1x1x1xf32>
    %cst_102 = arith.constant 1.600000e+01 : f32
    %141 = vector.broadcast %cst_102 : f32 to vector<1x1x1xf32>
    %142 = arith.divf %140, %141 : vector<1x1x1xf32>
    %143 = arith.mulf %134, %134 : vector<1x16x128xf32>
    %cst_103 = arith.constant dense<0.000000e+00> : vector<1x16xf32>
    %144 = vector.multi_reduction <add>, %143, %cst_103 [2] : vector<1x16x128xf32> to vector<1x16xf32>
    %145 = vector.shape_cast %144 : vector<1x16xf32> to vector<1x16x1xf32>
    %cst_104 = arith.constant 1.280000e+02 : f32
    %146 = vector.broadcast %cst_104 : f32 to vector<1x16x1xf32>
    %147 = arith.divf %145, %146 : vector<1x16x1xf32>
    %cst_105 = arith.constant dense<0.000000e+00> : vector<1x1xf32>
    %148 = vector.multi_reduction <add>, %147, %cst_105 [1] : vector<1x16x1xf32> to vector<1x1xf32>
    %149 = vector.shape_cast %148 : vector<1x1xf32> to vector<1x1x1xf32>
    %cst_106 = arith.constant 1.600000e+01 : f32
    %150 = vector.broadcast %cst_106 : f32 to vector<1x1x1xf32>
    %151 = arith.divf %149, %150 : vector<1x1x1xf32>
    %152 = arith.mulf %142, %142 : vector<1x1x1xf32>
    %153 = arith.subf %151, %152 : vector<1x1x1xf32>
    %cst_107 = arith.constant 0.000000e+00 : f32
    %154 = vector.broadcast %cst_107 : f32 to vector<1x1x1xf32>
    %155 = arith.maximumf %153, %154 : vector<1x1x1xf32>
    %cst_108 = arith.constant 9.99999974E-6 : f32
    %156 = vector.broadcast %cst_108 : f32 to vector<1x1x1xf32>
    %157 = arith.addf %155, %156 : vector<1x1x1xf32>
    %158 = math.rsqrt %157 : vector<1x1x1xf32>
    %c2_109 = arith.constant 2 : index
    %c0_110 = arith.constant 0 : index
    %c0_111 = arith.constant 0 : index
    %159 = vector.load %arg2[%c2_109, %c0_110, %c0_111] : memref<3x1x128xf32, #tpu.memory_space<vmem>>, vector<1x1x128xf32>
    %160 = vector.shape_cast %159 : vector<1x1x128xf32> to vector<1x128xf32>
    %c2_112 = arith.constant 2 : index
    %c0_113 = arith.constant 0 : index
    %c0_114 = arith.constant 0 : index
    %161 = vector.load %arg3[%c2_112, %c0_113, %c0_114] : memref<3x1x128xf32, #tpu.memory_space<vmem>>, vector<1x1x128xf32>
    %162 = vector.shape_cast %161 : vector<1x1x128xf32> to vector<1x128xf32>
    %163 = vector.shape_cast %160 : vector<1x128xf32> to vector<1x1x128xf32>
    %164 = vector.broadcast %158 : vector<1x1x1xf32> to vector<1x1x128xf32>
    %165 = arith.mulf %163, %164 : vector<1x1x128xf32>
    %166 = vector.broadcast %142 : vector<1x1x1xf32> to vector<1x1x128xf32>
    %167 = arith.mulf %166, %165 : vector<1x1x128xf32>
    %168 = vector.shape_cast %162 : vector<1x128xf32> to vector<1x1x128xf32>
    %169 = arith.subf %168, %167 : vector<1x1x128xf32>
    %170 = vector.broadcast %165 : vector<1x1x128xf32> to vector<1x16x128xf32>
    %171 = arith.mulf %134, %170 : vector<1x16x128xf32>
    %172 = vector.broadcast %169 : vector<1x1x128xf32> to vector<1x16x128xf32>
    %173 = arith.addf %171, %172 : vector<1x16x128xf32>
    %c0_115 = arith.constant 0 : index
    %c1_116 = arith.constant 1 : index
    %c0_117 = arith.constant 0 : index
    %174 = vector.load %arg7[%c0_115, %c1_116, %c0_117] : memref<1x18x128xf32, #tpu.memory_space<vmem>>, vector<1x16x128xf32>
    tpu.vector_store %arg7[%c0_115, %c1_116, %c0_117], %173 {strides = array<i32>} : memref<1x18x128xf32, #tpu.memory_space<vmem>>, vector<1x16x128xf32>,
    %c0_118 = arith.constant 0 : index
    %c0_119 = arith.constant 0 : index
    %c0_120 = arith.constant 0 : index
    %175 = vector.load %arg7[%c0_118, %c0_119, %c0_120] : memref<1x18x128xf32, #tpu.memory_space<vmem>>, vector<1x16x128xf32>
    %176 = vector.shape_cast %175 : vector<1x16x128xf32> to vector<16x128xf32>
    %c2_121 = arith.constant 2 : index
    %c0_122 = arith.constant 0 : index
    %c0_123 = arith.constant 0 : index
    %c0_124 = arith.constant 0 : index
    %177 = vector.load %arg4[%c2_121, %c0_122, %c0_123, %c0_124] : memref<3x3x128x128xf32, #tpu.memory_space<vmem>>, vector<1x1x128x128xf32>
    %178 = vector.shape_cast %177 : vector<1x1x128x128xf32> to vector<128x128xf32>
    %cst_125 = arith.constant dense<0.000000e+00> : vector<16x128xf32>
    %179 = tpu.matmul %176, %178, %cst_125 {dimension_numbers = #tpu.dot_dimension_numbers<[1], [0], [0], [1], [0, 0, 1, 1], [], []>} : vector<16x128xf32>, vector<128x128xf32>, vector<16x128xf32> -> vector<16x128xf32>
    %c0_126 = arith.constant 0 : index
    %c1_127 = arith.constant 1 : index
    %c0_128 = arith.constant 0 : index
    %180 = vector.load %arg7[%c0_126, %c1_127, %c0_128] : memref<1x18x128xf32, #tpu.memory_space<vmem>>, vector<1x16x128xf32>
    %181 = vector.shape_cast %180 : vector<1x16x128xf32> to vector<16x128xf32>
    %c2_129 = arith.constant 2 : index
    %c1_130 = arith.constant 1 : index
    %c0_131 = arith.constant 0 : index
    %c0_132 = arith.constant 0 : index
    %182 = vector.load %arg4[%c2_129, %c1_130, %c0_131, %c0_132] : memref<3x3x128x128xf32, #tpu.memory_space<vmem>>, vector<1x1x128x128xf32>
    %183 = vector.shape_cast %182 : vector<1x1x128x128xf32> to vector<128x128xf32>
    %cst_133 = arith.constant dense<0.000000e+00> : vector<16x128xf32>
    %184 = tpu.matmul %181, %183, %cst_133 {dimension_numbers = #tpu.dot_dimension_numbers<[1], [0], [0], [1], [0, 0, 1, 1], [], []>} : vector<16x128xf32>, vector<128x128xf32>, vector<16x128xf32> -> vector<16x128xf32>
    %185 = arith.addf %179, %184 : vector<16x128xf32>
    %c0_134 = arith.constant 0 : index
    %c2_135 = arith.constant 2 : index
    %c0_136 = arith.constant 0 : index
    %186 = vector.load %arg7[%c0_134, %c2_135, %c0_136] : memref<1x18x128xf32, #tpu.memory_space<vmem>>, vector<1x16x128xf32>
    %187 = vector.shape_cast %186 : vector<1x16x128xf32> to vector<16x128xf32>
    %c2_137 = arith.constant 2 : index
    %c2_138 = arith.constant 2 : index
    %c0_139 = arith.constant 0 : index
    %c0_140 = arith.constant 0 : index
    %188 = vector.load %arg4[%c2_137, %c2_138, %c0_139, %c0_140] : memref<3x3x128x128xf32, #tpu.memory_space<vmem>>, vector<1x1x128x128xf32>
    %189 = vector.shape_cast %188 : vector<1x1x128x128xf32> to vector<128x128xf32>
    %cst_141 = arith.constant dense<0.000000e+00> : vector<16x128xf32>
    %190 = tpu.matmul %187, %189, %cst_141 {dimension_numbers = #tpu.dot_dimension_numbers<[1], [0], [0], [1], [0, 0, 1, 1], [], []>} : vector<16x128xf32>, vector<128x128xf32>, vector<16x128xf32> -> vector<16x128xf32>
    %191 = arith.addf %185, %190 : vector<16x128xf32>
    %192 = vector.shape_cast %191 : vector<16x128xf32> to vector<1x16x128xf32>
    %c2_142 = arith.constant 2 : index
    %c0_143 = arith.constant 0 : index
    %c0_144 = arith.constant 0 : index
    %193 = vector.load %arg5[%c2_142, %c0_143, %c0_144] : memref<3x1x128xf32, #tpu.memory_space<vmem>>, vector<1x1x128xf32>
    %194 = vector.shape_cast %193 : vector<1x1x128xf32> to vector<1x128xf32>
    %195 = vector.shape_cast %194 : vector<1x128xf32> to vector<1x1x128xf32>
    %196 = vector.broadcast %195 : vector<1x1x128xf32> to vector<1x16x128xf32>
    %197 = arith.addf %192, %196 : vector<1x16x128xf32>
    %198 = arith.addf %197, %134 : vector<1x16x128xf32>
    %c0_145 = arith.constant 0 : index
    %c0_146 = arith.constant 0 : index
    %c0_147 = arith.constant 0 : index
    %199 = vector.load %arg6[%c0_145, %c0_146, %c0_147] : memref<1x16x128xf32, #tpu.memory_space<vmem>>, vector<1x16x128xf32>
    tpu.vector_store %arg6[%c0_145, %c0_146, %c0_147], %198 {strides = array<i32>} : memref<1x16x128xf32, #tpu.memory_space<vmem>>, vector<1x16x128xf32>,
    return
  }
  func.func @transform_0(%arg0: i32) -> (i32, i32, i32) {
    %c0_i32 = arith.constant 0 : i32
    %c0_i32_0 = arith.constant 0 : i32
    %c0_i32_1 = arith.constant 0 : i32
    return %arg0, %c0_i32, %c0_i32_0 : i32, i32, i32
  }
  func.func @transform_1(%arg0: i32) -> (i32, i32, i32) {
    %c0_i32 = arith.constant 0 : i32
    %c0_i32_0 = arith.constant 0 : i32
    %c0_i32_1 = arith.constant 0 : i32
    %c0_i32_2 = arith.constant 0 : i32
    return %c0_i32, %c0_i32_0, %c0_i32_1 : i32, i32, i32
  }
  func.func @transform_2(%arg0: i32) -> (i32, i32, i32) {
    %c0_i32 = arith.constant 0 : i32
    %c0_i32_0 = arith.constant 0 : i32
    %c0_i32_1 = arith.constant 0 : i32
    %c0_i32_2 = arith.constant 0 : i32
    return %c0_i32, %c0_i32_0, %c0_i32_1 : i32, i32, i32
  }
  func.func @transform_3(%arg0: i32) -> (i32, i32, i32, i32) {
    %c0_i32 = arith.constant 0 : i32
    %c0_i32_0 = arith.constant 0 : i32
    %c0_i32_1 = arith.constant 0 : i32
    %c0_i32_2 = arith.constant 0 : i32
    %c0_i32_3 = arith.constant 0 : i32
    return %c0_i32, %c0_i32_0, %c0_i32_1, %c0_i32_2 : i32, i32, i32, i32
  }
  func.func @transform_4(%arg0: i32) -> (i32, i32, i32) {
    %c0_i32 = arith.constant 0 : i32
    %c0_i32_0 = arith.constant 0 : i32
    %c0_i32_1 = arith.constant 0 : i32
    %c0_i32_2 = arith.constant 0 : i32
    return %c0_i32, %c0_i32_0, %c0_i32_1 : i32, i32, i32
  }
  func.func @transform_5(%arg0: i32) -> (i32, i32, i32) {
    %c0_i32 = arith.constant 0 : i32
    %c0_i32_0 = arith.constant 0 : i32
    %c0_i32_1 = arith.constant 0 : i32
    return %arg0, %c0_i32, %c0_i32_0 : i32, i32, i32
  }
}

</mosaic_0001>

<bundles_post_ra>
// kernel: tpu_custom_call.1
= control target key start
LH: loop header
LB: loop body
LE: loop exit
PB: predicated region body
PF: predicated region fallthrough
CT: control target
= control target key end

     0   :  { %10 = vsyncpa [#allocation4], 0  ;;  %s2502_s0 = inlined_call_operand.hbm [shape: f32[2,16,128], index: 0, kind: input, shape index: {}]   ;;  %s2503_s1 = inlined_call_operand.hbm [shape: f32[3,1,128], index: 1, kind: input, shape index: {}]   ;;  %s2504_s2 = inlined_call_operand.vmem [shape: f32[3,1,128], index: 2, kind: input, shape index: {}]   ;;  %s2505_s3 = inlined_call_operand.hbm [shape: f32[3,3,128,128], index: 3, kind: input, shape index: {}]   ;;  %s2506_s4 = inlined_call_operand.vmem [shape: f32[3,1,128], index: 4, kind: input, shape index: {}]   ;;  %s2507_s5 = inlined_call_operand.hbm [shape: f32[2,16,128], index: 5, kind: output, shape index: {}]  }
   0x1   :  { %12 = vsyncpa [#allocation4 + $0x1], 0 }
   0x2   :  { %13 = vsyncpa [#allocation7], 0 }
   0x3   :  { %14 = vsyncpa [#allocation5], 0 }
   0x4   :  { %16 = vsyncpa [#allocation5 + $0x1], 0  ;;  %s2227_s18 = smov 0   ;;  %s2229_s19 = smov 0  }
   0x5   :  { %s2231_s20 = smov 0   ;;  %s2233_s21 = smov 0  }
   0x6 LB: > { %s2248_s22 = sadd.s32 4294967295, %s2184_s21   ;;  %s1452_s23 = sadd.s32 4294967294, %s2184_s21   ;;  %s2184_s21 = sphi %s2233_s21, %s2530_s21   ;;  %s2180_s20 = sphi %s2231_s20, %s2529_s20   ;;  %s2176_s19 = sphi %s2229_s19, %s2528_s19   ;;  %s2172_s18 = sphi %s2227_s18, %s2527_s18  }
   0x7   : > { %p42_p0 = scmp.ne.s32.totalorder %s2176_s19, %s2172_s18  ;;  %p2508_p1 = scmp.eq.s32.totalorder %s2248_s22, 0 }
   0x8   : > { %p150_p2 = scmp.eq.s32.totalorder %s2248_s22, 1  ;;  %p156_p3 = scmp.eq.s32.totalorder %s1452_s23, 1 }
   0x9   : > { %p2257_p4 = por %p2508_p1, %p42_p0  ;;  %p1453_p5 = scmp.ge.s32.totalorder %s2184_s21, 1 }
   0xa   : > { %p2262_p6 = por %p156_p3, %p42_p0  ;;  %p163_p7 = scmp.lt.s32.totalorder %s2184_s21, 3 }
   0xb   : > { %s2513_s24 = scalar_select %p2257_p4, 1, 0 }
   0xc   : > { %s2514_s25 = scalar_select %p2262_p6, 1, 0 }
   0xd   : > { %p2267_p8 = pnand %p1453_p5, %p163_p7  ;;  %s2186_s27 = smov [#allocation6]  }
   0xe   : > { %s175_s28 = sshll.u32 %s2186_s27, 4  ;;  %s2187_s30 = smov [#allocation8]   ;;  %s176_s28 = int_to_ptr.vmem [resolvable:$true] %s175_s28 }
   0xf   : > { %s2515_s26 = scalar_select %p2267_p8, 1, 0 }
  0x10   : > { %p1968_p9 = pneg %p2267_p8  ;;  %s191_s6 = sshll.u32 %s2187_s30, 4  ;;  %s2280_s6 = int_to_ptr.vmem [resolvable:$true] %s191_s6 }
  0x11   : > { %s2047_s7 = scalar_lea.vmem %s176_s28, 48  ;;  %s2054_s8 = scalar_lea.vmem %s176_s28, 64 }
  0x12   : > { %p2276_p11 = pnand %p1968_p9, %p2508_p1  ;;  %p2048_p13 = scmp.ne.s32.totalorder %s176_s28, %s2047_s7 }
  0x13   : > { %p2055_p5 = scmp.lt.s32.totalorder %s176_s28, %s176_s28  ;;  %p2056_p7 = scmp.lt.s32.totalorder %s2054_s8, %s2047_s7 }
  0x14   : > { %p2038_p12 = pneg %p2276_p11 }
  0x15   : > { %p2057_p9 = por %p2056_p7, %p2055_p5 }
  0x16   : > { %p2050_p0 = pnand %p2048_p13, %p2038_p12 }
  0x18   : > { %p2051_p3 = pneg %p2050_p0 }
  0x1a   : > { %p2058_p10 = pnand %p2057_p9, %p2051_p3 }
  0x1c   : > { %2061 = shalt.err (!%p2058_p10)
}
  0x1d   : > { %s2188_s9 = smov 16   ;;  %s2189_s10 = smov 1  }
  0x1e   : > { %1971 = dma.hbm_to_vmem [thread:$0]  (!%p2276_p11), %s2503_s1, 48, %s176_s28, [#allocation7], %s2188_s9, %s2188_s9, %s2189_s10  }
  0x1f   : > { %s2073_s13 = scalar_lea.vmem %s2280_s6, 18432  ;;  %p2081_p10 = scmp.lt.s32.totalorder %s2280_s6, %s2280_s6 }
  0x20   : > { %p2074_p13 = scmp.ne.s32.totalorder %s2280_s6, %s2073_s13  ;;  %p2082_p3 = scmp.lt.s32.totalorder %s2073_s13, %s2073_s13 }
  0x22   : > { %p2076_p0 = pnand %p2074_p13, %p2038_p12  ;;  %p2083_p7 = por %p2082_p3, %p2081_p10 }
  0x24   : > { %p2077_p5 = pneg %p2076_p0 }
  0x26   : > { %p2084_p9 = pnand %p2083_p7, %p2077_p5 }
  0x28   : > { %2087 = shalt.err (!%p2084_p9)
}
  0x29   : > { %s2509_s14 = smov 128   ;;  %s2191_s15 = smov 8  }
  0x2a   : > { %1974 = dma.hbm_to_vmem [thread:$0]  (!%p2276_p11), %s2505_s3, 18432, %s2280_s6, [#allocation7], %s2509_s14, %s2509_s14, %s2191_s15  }
  0x2b   : > { %s2309_s23 = sadd.s32 1, %s2184_s21   ;;  %s29_s28 = sadd.s32 1, %s2180_s20 }
  0x2c   : > { %s26_s27 = ssub.s32 %s2184_s21, %s2309_s23  ;;  %p36_p13 = scmp.ne.s32.totalorder %s2180_s20, %s2176_s19 }
  0x2d   : > { %p27_p12 = scmp.eq.s32.totalorder %s26_s27, 0  ;;  %p37_p0 = scmp.eq.s32.totalorder %s2184_s21, 0 }
  0x2e   : > { %p2322_p10 = por %p150_p2, %p36_p13  ;;  %p1985_p3 = scmp.lt.s32.totalorder %s2184_s21, 2 }
  0x2f   : > { %s2318_s30 = scalar_select %p27_p12, %s2180_s20, %s29_s28  }
  0x30   : > { %p38_p5 = por %p37_p0, %p36_p13  ;;  %s208_s7 = sand.u32 1, %s2180_s20  }
  0x31   : > { %s2517_s29 = scalar_select %p2322_p10, 1, 0 }
  0x32   : > { %s1457_s8 = sshll.u32 %s208_s7, 4  ;;  %s1477_s6 = sshll.u32 %s2184_s21, 8 }
  0x33   : > { %s2332_s11 = scalar_lea.hbm %s2502_s0, %s1477_s6  ;;  %s212_s12 = scalar_lea.vmem [#allocation3], %s1457_s8 }
  0x34   : > { %s219_s13 = sshll.u32 %s212_s12, 4  ;;  %p2336_p2 = pnand %p1985_p3, %p38_p5  ;;  %s2334_s13 = int_to_ptr.vmem [resolvable:$true] %s219_s13 }
  0x35   : > { %s2340_s17 = scalar_lea.sflag [#allocation4], %s208_s7  ;;  %s2088_s27 = scalar_lea.hbm %s2332_s11, 256 }
  0x36   : > { %p2089_p11 = scmp.ne.s32.totalorder %s2332_s11, %s2088_s27  ;;  %p2090_p7 = pneg %p2336_p2 }
  0x37   : > { %s2093_s8 = scalar_lea.hbm %s2502_s0, 512  ;;  %p2094_p13 = scmp.lt.s32.totalorder %s2332_s11, %s2502_s0 }
  0x38   : > { %p2091_p9 = pnand %p2090_p7, %p2089_p11  ;;  %p2095_p0 = scmp.lt.s32.totalorder %s2093_s8, %s2088_s27 }
  0x3a   : > { %p2092_p12 = pneg %p2091_p9  ;;  %p2096_p5 = por %p2095_p0, %p2094_p13 }
  0x3c   : > { %p2097_p3 = pnand %p2096_p5, %p2092_p12 }
  0x3e   : > { %2100 = shalt.err (!%p2097_p3)
}
  0x3f   : > { %s2101_s7 = scalar_lea.vmem %s2334_s13, 256  ;;  %s2192_s12 = smov [#allocation3]  }
  0x40   : > { %p2102_p1 = scmp.ne.s32.totalorder %s2334_s13, %s2101_s7  ;;  %s2106_s14 = sshll.u32 %s2192_s12, 4  ;;  %s2107_s14 = int_to_ptr.vmem [resolvable:$false] %s2106_s14 }
  0x41   : > { %s2108_s28 = scalar_lea.vmem %s2107_s14, 512  ;;  %p2109_p9 = scmp.lt.s32.totalorder %s2334_s13, %s2107_s14 }
  0x42   : > { %p2104_p6 = pnand %p2102_p1, %p2090_p7  ;;  %p2110_p10 = scmp.lt.s32.totalorder %s2108_s28, %s2101_s7 }
  0x44   : > { %p2105_p11 = pneg %p2104_p6  ;;  %p2111_p4 = por %p2110_p10, %p2109_p9 }
  0x46   : > { %p2112_p8 = pnand %p2111_p4, %p2105_p11 }
  0x48   : > { %2115 = shalt.err (!%p2112_p8)
}
  0x49   : > { %s2519_s27 = smov 128   ;;  %p2520_p1 = scmp.ne.s32.totalorder %s2515_s26, 0 }
  0x4a   : > { %1978 = dma.hbm_to_vmem [thread:$0]  (!%p2336_p2), %s2332_s11, 256, %s2334_s13, %s2340_s17, %s2519_s27, %s2519_s27, %s2191_s15  }
  0x4b   : > { %231 = sbr.rel (%p2520_p1) target bundleno = 1378 (0x562), region = 40  ;;  %s2367_s6 = sand.u32 (!%p2520_p1), 1, %s2176_s19  }
  0x4c   : > { %s1461_s14 = sshll.u32 (!%p2520_p1), %s2367_s6, 4  ;;  %s234_s8 = scalar_lea.sflag (!%p2520_p1), [#allocation4], %s2367_s6 }
  0x4d   : > { %s237_s16 = scalar_lea.vmem (!%p2520_p1), [#allocation3], %s1461_s14  ;;  %p2521_p4 = scmp.ne.s32.totalorder (!%p2520_p1), %s2513_s24, 0 }
  0x50   : > { %2159 = dma.done.wait (%p2521_p4), %s234_s8, 256  }
  0x51   : > { %2161 = vsyncadd (%p2521_p4), %s234_s8, 4294967040  ;;  %p2522_p6 = scmp.eq.s32.totalorder %s2248_s22, 0 }
  0x53   : > { %2163 = dma.done.wait (%p2522_p6), [#allocation7], 18480   ;;  %p2523_p8 = pmov %p2522_p6 }
  0x54   : > { %v2381_v0 = vld [vmem:[%s237_s16] sm:$0xff]  ;;  %v2383_v1 = vld [vmem:[%s237_s16 + $0x8] sm:$0xff]  ;;  %v2193_v35 = vmov 0.0   ;;  %s271_s8 = scalar_lea.vmem [#allocation9], %s1461_s14  ;;  %s1478_s24 = sshll.u32 %s2248_s22, 8 }
  0x55   : > { %2165 = vsyncadd (%p2523_p8), [#allocation7], 4294948816  ;;  %276 = vadd.xlane.f32.xlu0 %v2381_v0  ;;  %v292_v2 = vmul.f32 %v2381_v0, %v2381_v0  ;;  %v293_v3 = vmul.f32 %v2383_v1, %v2383_v1  ;;  %v374_v4 = vld [vmem:[#allocation8 + $0xf8] sm:$0xff]  ;;  %v373_v5 = vld [vmem:[#allocation8 + $0xf0] sm:$0xff]  ;;  %274 = vst [vmem:[#allocation2] sm:$0x1] %v2193_v35  ;;  %s2458_s11 = scalar_lea.hbm %s2507_s5, %s1478_s24 }
  0x56   : > { %1641 = vmatprep.subr.mxu0 %v374_v4  ;;  %v372_v6 = vld [vmem:[#allocation8 + $0xe8] sm:$0xff]  ;;  %v371_v7 = vld [vmem:[#allocation8 + $0xe0] sm:$0xff]  ;;  %v370_v8 = vld [vmem:[#allocation8 + $0xd8] sm:$0xff]  ;;  %275 = vst [vmem:[#allocation2 + $0x11] sm:$0x1] %v2193_v35  ;;  %s1360_s16 = sshll.u32 %s271_s8, 4  ;;  %s2453_s16 = int_to_ptr.vmem [resolvable:$true] %s1360_s16 }
  0x57   : > { %294 = vadd.xlane.f32.xlu1 %v292_v2  ;;  %1642 = vmatpush3.msra.mxu0 %v374_v4  ;;  %v355_v9 = vld [vmem:[#allocation8 + $0x78] sm:$0xff]  ;;  %v369_v10 = vld [vmem:[#allocation8 + $0xd0] sm:$0xff]  ;;  %v368_v12 = vld [vmem:[#allocation8 + $0xc8] sm:$0xff]  ;;  %v319_v4 = vlaneseq  ;;  %s1347_s14 = scalar_lea.sflag [#allocation5], %s2367_s6  ;;  %s2116_s13 = scalar_lea.vmem %s2453_s16, 256 }
  0x58   : > { %1643 = vmatprep.subr.mxu0 %v373_v5  ;;  %1676 = vmatprep.subr.mxu1 %v355_v9  ;;  %v354_v11 = vld [vmem:[#allocation8 + $0x70] sm:$0xff]  ;;  %v353_v13 = vld [vmem:[#allocation8 + $0x68] sm:$0xff]  ;;  %v367_v14 = vld [vmem:[#allocation8 + $0xc0] sm:$0xff]  ;;  %p2117_p10 = scmp.ne.s32.totalorder %s2453_s16, %s2116_s13  ;;  %p2524_p2 = scmp.ne.s32.totalorder %s2517_s29, 0 }
  0x59   : > { %278 = vadd.xlane.f32.xlu0 %v2383_v1  ;;  %1644 = vmatpush3.msra.mxu0 %v373_v5  ;;  %v352_v15 = vld [vmem:[#allocation8 + $0x60] sm:$0xff]  ;;  %v366_v16 = vld [vmem:[#allocation8 + $0xb8] sm:$0xff]  ;;  %v365_v18 = vld [vmem:[#allocation8 + $0xb0] sm:$0xff]  ;;  %v320_v5 = vshrl.u32 %v319_v4, 7  ;;  %s2194_s22 = smov [#allocation9]  }
  0x5a   : > { %1645 = vmatprep.subr.mxu0 %v372_v6  ;;  %1677 = vmatpush3.msra.mxu1 %v355_v9  ;;  %v351_v17 = vld [vmem:[#allocation8 + $0x58] sm:$0xff]  ;;  %v350_v19 = vld [vmem:[#allocation8 + $0x50] sm:$0xff]  ;;  %v364_v20 = vld [vmem:[#allocation8 + $0xa8] sm:$0xff]  ;;  %p2118_p7 = pnand %p2117_p10, %p2524_p2  ;;  %s2120_s17 = sshll.u32 %s2194_s22, 4  ;;  %s2121_s17 = int_to_ptr.vmem [resolvable:$false] %s2120_s17 }
  0x5b   : > { %296 = vadd.xlane.f32.xlu1 %v293_v3  ;;  %1646 = vmatpush3.msra.mxu0 %v372_v6  ;;  %v349_v21 = vld [vmem:[#allocation8 + $0x48] sm:$0xff]  ;;  %v363_v22 = vld [vmem:[#allocation8 + $0xa0] sm:$0xff]  ;;  %v362_v24 = vld [vmem:[#allocation8 + $0x98] sm:$0xff]  ;;  %s2122_s9 = scalar_lea.vmem %s2121_s17, 512  ;;  %p2123_p13 = scmp.lt.s32.totalorder %s2453_s16, %s2121_s17 }
  0x5c   : > { %1647 = vmatprep.subr.mxu0 %v371_v7  ;;  %1678 = vmatprep.subr.mxu1 %v354_v11  ;;  %v348_v23 = vld [vmem:[#allocation8 + $0x40] sm:$0xff]  ;;  %v347_v25 = vld [vmem:[#allocation8 + $0x38] sm:$0xff]  ;;  %v361_v26 = vld [vmem:[#allocation8 + $0x90] sm:$0xff]  ;;  %p2119_p12 = pneg %p2118_p7  ;;  %p2124_p0 = scmp.lt.s32.totalorder %s2122_s9, %s2116_s13 }
  0x5d   : > { %1648 = vmatpush3.msra.mxu0 %v371_v7  ;;  %1679 = vmatpush3.msra.mxu1 %v354_v11  ;;  %v346_v27 = vld [vmem:[#allocation8 + $0x30] sm:$0xff]  ;;  %v360_v28 = vld [vmem:[#allocation8 + $0x88] sm:$0xff]  ;;  %v359_v30 = vld [vmem:[#allocation8 + $0x80] sm:$0xff]  ;;  %v2394_v7 = vsub.s32 0, %v320_v5 }
  0x5e   : > { %1649 = vmatprep.subr.mxu0 %v370_v8  ;;  %1680 = vmatprep.subr.mxu1 %v353_v13  ;;  %v345_v29 = vld [vmem:[#allocation8 + $0x28] sm:$0xff]  ;;  %v344_v31 = vld [vmem:[#allocation8 + $0x20] sm:$0xff]  ;;  %v2391_v32 = vld [vmem:[#allocation8 + $0x178] sm:$0xff]  ;;  %p2125_p5 = por %p2124_p0, %p2123_p13 }
  0x5f   : > { %1650 = vmatpush3.msra.mxu0 %v370_v8  ;;  %1681 = vmatpush3.msra.mxu1 %v353_v13  ;;  %v343_v33 = vld [vmem:[#allocation8 + $0x18] sm:$0xff]  ;;  %v342_v34 = vld [vmem:[#allocation8 + $0x10] sm:$0xff]  ;;  %v341_v36 = vld [vmem:[#allocation8 + $0x8] sm:$0xff] }
  0x60   : > { %1651 = vmatprep.subr.mxu0 %v369_v10  ;;  %1682 = vmatprep.subr.mxu1 %v352_v15  ;;  %v340_v37 = vld [vmem:[#allocation8] sm:$0xff]  ;;  %v313_v6 = vld [vmem:[#allocation6] sm:$0x1]  ;;  %p2126_p3 = pnand %p2125_p5, %p2119_p12 }
  0x61   : > { %1652 = vmatpush3.msra.mxu0 %v369_v10  ;;  %1683 = vmatpush3.msra.mxu1 %v352_v15  ;;  %v314_v10 = vld [vmem:[%s2504_s2] sm:$0x1]  ;;  %v531_v35 = vld [vmem:[#allocation8 + $0x118] sm:$0xff] }
  0x62   : > { %1653 = vmatprep.subr.mxu0 %v368_v12  ;;  %1684 = vmatprep.subr.mxu1 %v351_v17  ;;  %v707_v4 = vld [vmem:[#allocation8 + $0x1e0] sm:$0xff]  ;;  %v721_v5 = vld [vmem:[#allocation8 + $0x238] sm:$0xff] }
  0x63   : > { %1654 = vmatpush3.msra.mxu0 %v368_v12  ;;  %1685 = vmatpush3.msra.mxu1 %v351_v17 }
  0x64   : > { %1655 = vmatprep.subr.mxu0 %v367_v14  ;;  %1686 = vmatprep.subr.mxu1 %v350_v19 }
  0x65   : > { %1656 = vmatpush3.msra.mxu0 %v367_v14  ;;  %1687 = vmatpush3.msra.mxu1 %v350_v19 }
  0x66   : > { %1657 = vmatprep.subr.mxu0 %v366_v16  ;;  %1688 = vmatprep.subr.mxu1 %v349_v21 }
  0x67   : > { %1658 = vmatpush3.msra.mxu0 %v366_v16  ;;  %1689 = vmatpush3.msra.mxu1 %v349_v21  ;;  %v542_v21 = vld [vmem:[#allocation8 + $0x170] sm:$0xff] }
  0x68   : > { %1659 = vmatprep.subr.mxu0 %v365_v18  ;;  %1690 = vmatprep.subr.mxu1 %v348_v23 }
  0x69   : > { %1660 = vmatpush3.msra.mxu0 %v365_v18  ;;  %1691 = vmatpush3.msra.mxu1 %v348_v23  ;;  %v540_v23 = vld [vmem:[#allocation8 + $0x160] sm:$0xff] }
  0x6a   : > { %1661 = vmatprep.subr.mxu0 %v364_v20  ;;  %1692 = vmatprep.subr.mxu1 %v347_v25 }
  0x6b   : > { %1662 = vmatpush3.msra.mxu0 %v364_v20  ;;  %1693 = vmatpush3.msra.mxu1 %v347_v25 }
  0x6c   : > { %1663 = vmatprep.subr.mxu0 %v363_v22  ;;  %1694 = vmatprep.subr.mxu1 %v346_v27 }
  0x6d   : > { %1664 = vmatpush3.msra.mxu0 %v363_v22  ;;  %1695 = vmatpush3.msra.mxu1 %v346_v27  ;;  %v541_v22 = vld [vmem:[#allocation8 + $0x168] sm:$0xff] }
  0x6e   : > { %1665 = vmatprep.subr.mxu0 %v362_v24  ;;  %1696 = vmatprep.subr.mxu1 %v345_v29 }
  0x6f   : > { %1666 = vmatpush3.msra.mxu0 %v362_v24  ;;  %1697 = vmatpush3.msra.mxu1 %v345_v29  ;;  %v539_v24 = vld [vmem:[#allocation8 + $0x158] sm:$0xff]  ;;  %v537_v29 = vld [vmem:[#allocation8 + $0x148] sm:$0xff] }
  0x70   : > { %1667 = vmatprep.subr.mxu0 %v361_v26  ;;  %1698 = vmatprep.subr.mxu1 %v344_v31 }
  0x71   : > { %1668 = vmatpush3.msra.mxu0 %v361_v26  ;;  %1699 = vmatpush3.msra.mxu1 %v344_v31  ;;  %v535_v31 = vld [vmem:[#allocation8 + $0x138] sm:$0xff] }
  0x72   : > { %1669 = vmatprep.subr.mxu0 %v360_v28  ;;  %1700 = vmatprep.subr.mxu1 %v343_v33 }
  0x73   : > { %1670 = vmatpush3.msra.mxu0 %v360_v28  ;;  %1701 = vmatpush3.msra.mxu1 %v343_v33  ;;  %v538_v28 = vld [vmem:[#allocation8 + $0x150] sm:$0xff]  ;;  %v533_v33 = vld [vmem:[#allocation8 + $0x128] sm:$0xff] }
  0x74   : > { %1671 = vmatprep.subr.mxu0 %v359_v30  ;;  %1702 = vmatprep.subr.mxu1 %v342_v34 }
  0x75   : > { %1672 = vmatpush3.msra.mxu0 %v359_v30  ;;  %1703 = vmatpush3.msra.mxu1 %v342_v34  ;;  %v536_v30 = vld [vmem:[#allocation8 + $0x140] sm:$0xff] }
  0x76   : > { %1711 = vmatprep.subr.mxu0 %v2391_v32  ;;  %1704 = vmatprep.subr.mxu1 %v341_v36  ;;  %v532_v34 = vld [vmem:[#allocation8 + $0x120] sm:$0xff] }
  0x77   : > { %1705 = vmatpush3.msra.mxu1 %v341_v36  ;;  %v530_v36 = vld [vmem:[#allocation8 + $0x110] sm:$0xff] }
  0x78   : > { %1706 = vmatprep.subr.mxu1 %v340_v37 }
  0x79   : > { %1707 = vmatpush3.msra.mxu1 %v340_v37  ;;  %v529_v37 = vld [vmem:[#allocation8 + $0x108] sm:$0xff] }
  0xde   : > { %v277_v38 = vpop.xlane.xlu0 %276 }
  0xdf   : > { %v281_v41 = vmul.f32 0.0078125, %v277_v38  ;;  %v528_v38 = vld [vmem:[#allocation8 + $0x100] sm:$0xff] }
  0xe0   : > { %v295_v39 = vpop.xlane.xlu1 %294 }
  0xe1   : > { %v298_v44 = vmul.f32 0.0078125, %v295_v39 }
  0xe2   : > { %v279_v40 = vpop.xlane.xlu0 %278 }
  0xe3   : > { %v282_v42 = vmul.f32 0.0078125, %v279_v40 }
  0xe4   : > { %v297_v43 = vpop.xlane.xlu1 %296 }
  0xe5   : > { %v283_v45 = vadd.f32 %v282_v42, %v281_v41  ;;  %v299_v46 = vmul.f32 0.0078125, %v297_v43 }
  0xe7   : > { %v284_v47 = vrot.slane %v283_v45, 4  ;;  %v300_v48 = vadd.f32 %v299_v46, %v298_v44  ;;  %v1465_v46 = vld [vmem:[%s2506_s4] ss:$0 sm:$0xff] }
  0xe9   : > { %v285_v49 = vadd.f32 %v284_v47, %v283_v45  ;;  %v301_v50 = vrot.slane %v300_v48, 4 }
  0xeb   : > { %v286_v51 = vrot.slane %v285_v49, 2  ;;  %v302_v52 = vadd.f32 %v301_v50, %v300_v48 }
  0xed   : > { %v287_v53 = vadd.f32 %v286_v51, %v285_v49  ;;  %v303_v54 = vrot.slane %v302_v52, 2 }
  0xef   : > { %v288_v55 = vrot.slane %v287_v53, 1  ;;  %v304_v56 = vadd.f32 %v303_v54, %v302_v52 }
  0xf1   : > { %v289_v57 = vadd.f32 %v288_v55, %v287_v53  ;;  %v305_v58 = vrot.slane %v304_v56, 1  ;;  %v729_v55 = vld [vmem:[#allocation8 + $0x278] sm:$0xff] }
  0xf2   : > { %1746 = vmatprep.subr.mxu1 %v729_v55 }
  0xf3   : > { %v291_v59 = vmul.f32 0.0625, %v289_v57  ;;  %v306_v60 = vadd.f32 %v305_v58, %v304_v56  ;;  %v728_v56 = vld [vmem:[#allocation8 + $0x270] sm:$0xff]  ;;  %v727_v57 = vld [vmem:[#allocation8 + $0x268] sm:$0xff]  ;;  %v726_v58 = vld [vmem:[#allocation8 + $0x260] sm:$0xff] }
  0xf5   : > { %v308_v61 = vmul.f32 %v291_v59, %v291_v59  ;;  %v307_v62 = vmul.f32 0.0625, %v306_v60  ;;  %v710_v60 = vld [vmem:[#allocation8 + $0x1f8] sm:$0xff] }
  0xf7   : > { %v309_v63 = vsub.f32 %v307_v62, %v308_v61  ;;  %v724_v61 = vld [vmem:[#allocation8 + $0x250] sm:$0xff] }
  0xf8   : > { %v709_v62 = vld [vmem:[#allocation8 + $0x1f0] sm:$0xff] }
  0xf9   : > { %v310_v2 = vmax.f32 %v309_v63, 0.0  ;;  %v723_v63 = vld [vmem:[#allocation8 + $0x248] sm:$0xff] }
  0xfb   : > { %v311_v3 = vadd.f32 1e-05, %v310_v2  ;;  %v708_v2 = vld [vmem:[#allocation8 + $0x1e8] sm:$0xff] }
  0xfd   : > { %2030 = vrsqrt.f32 %v311_v3  ;;  %v722_v3 = vld [vmem:[#allocation8 + $0x240] sm:$0xff] }
 0x10a   : > { %v2031_v8 = vpop.eup %2030 }
 0x10b   : > { %v315_v9 = vmul.f32 %v2031_v8, %v313_v6  ;;  %v706_v6 = vld [vmem:[#allocation8 + $0x1d8] sm:$0xff]  ;;  %v720_v8 = vld [vmem:[#allocation8 + $0x230] sm:$0xff] }
 0x10d   : > { %v316_v11 = vmul.f32 %v315_v9, %v291_v59  ;;  %v322_v12 = vrot.slane %v315_v9, %v2394_v7  ;;  %v725_v59 = vld [vmem:[#allocation8 + $0x258] sm:$0xff]  ;;  %v705_v9 = vld [vmem:[#allocation8 + $0x1d0] sm:$0xff] }
 0x10f   : > { %v317_v13 = vsub.f32 %v314_v10, %v316_v11  ;;  %v324_v14 = vmul.f32 %v322_v12, %v2381_v0  ;;  %v325_v15 = vmul.f32 %v322_v12, %v2383_v1  ;;  %v719_v10 = vld [vmem:[#allocation8 + $0x228] sm:$0xff]  ;;  %v718_v12 = vld [vmem:[#allocation8 + $0x220] sm:$0xff] }
 0x110   : > { %v704_v11 = vld [vmem:[#allocation8 + $0x1c8] sm:$0xff] }
 0x111   : > { %v330_v16 = vrot.slane %v317_v13, %v2394_v7  ;;  %v703_v13 = vld [vmem:[#allocation8 + $0x1c0] sm:$0xff] }
 0x113   : > { %v332_v17 = vadd.f32 %v330_v16, %v324_v14  ;;  %v333_v18 = vadd.f32 %v330_v16, %v325_v15  ;;  %v717_v14 = vld [vmem:[#allocation8 + $0x218] sm:$0xff]  ;;  %v716_v16 = vld [vmem:[#allocation8 + $0x210] sm:$0xff] }
 0x114   : > { %v702_v15 = vld [vmem:[#allocation8 + $0x1b8] sm:$0xff] }
 0x115   : > { %v334_v19 = vmax.f32 %v332_v17, 0.0  ;;  %v335_v20 = vmax.f32 %v333_v18, 0.0  ;;  %v701_v17 = vld [vmem:[#allocation8 + $0x1b0] sm:$0xff]  ;;  %v715_v18 = vld [vmem:[#allocation8 + $0x208] sm:$0xff] }
 0x117   : > { %336 = vst [vmem:[#allocation2 + $0x1] sm:$0xff] %v334_v19  ;;  %337 = vst [vmem:[#allocation2 + $0x9] sm:$0xff] %v335_v20  ;;  %1673 = vmatprep.mubr.f32.mxu0 %v334_v19  ;;  %v700_v19 = vld [vmem:[#allocation8 + $0x1a8] sm:$0xff] }
 0x118   : > { %1674 = vmatmul.mubr.f32.vlgmr.msra.gmra.mxu0 %v335_v20  ;;  %v714_v20 = vld [vmem:[#allocation8 + $0x200] sm:$0xff] }
 0x119   : > { %1712 = vmatpush3.msra.mxu0 %v2391_v32  ;;  %v534_v32 = vld [vmem:[#allocation8 + $0x130] sm:$0xff] }
 0x11a   : > { %1713 = vmatprep.subr.mxu0 %v542_v21 }
 0x11b   : > { %1714 = vmatpush3.msra.mxu0 %v542_v21  ;;  %v699_v21 = vld [vmem:[#allocation8 + $0x1a0] sm:$0xff] }
 0x11c   : > { %1715 = vmatprep.subr.mxu0 %v541_v22 }
 0x11d   : > { %1716 = vmatpush3.msra.mxu0 %v541_v22  ;;  %v898_v22 = vld [vmem:[#allocation8 + $0x2f8] sm:$0xff] }
 0x11e   : > { %v338_v25 = vld [vmem:[#allocation2] sm:$0xff]  ;;  %v339_v26 = vld [vmem:[#allocation2 + $0x8] sm:$0xff]  ;;  %1717 = vmatprep.subr.mxu0 %v540_v23 }
 0x11f   : > { %v525_v27 = vld [vmem:[#allocation2 + $0x2] sm:$0xff]  ;;  %1708 = vmatprep.mubr.f32.mxu1 %v338_v25  ;;  %1718 = vmatpush3.msra.mxu0 %v540_v23  ;;  %v526_v39 = vld [vmem:[#allocation2 + $0xa] sm:$0xff]  ;;  %v698_v23 = vld [vmem:[#allocation8 + $0x198] sm:$0xff] }
 0x120   : > { %1743 = vmatprep.mubr.f32.mxu0 %v525_v27  ;;  %1709 = vmatmul.mubr.f32.vlgmr.msra.gmra.mxu1 %v339_v26  ;;  %v696_v25 = vld [vmem:[#allocation8 + $0x188] sm:$0xff]  ;;  %v695_v26 = vld [vmem:[#allocation8 + $0x180] sm:$0xff] }
 0x121   : > { %1719 = vmatprep.subr.mxu0 %v539_v24  ;;  %1747 = vmatpush3.msra.mxu1 %v729_v55 }
 0x122   : > { %1720 = vmatpush3.msra.mxu0 %v539_v24  ;;  %1748 = vmatprep.subr.mxu1 %v728_v56  ;;  %v697_v24 = vld [vmem:[#allocation8 + $0x190] sm:$0xff] }
 0x123   : > { %1721 = vmatprep.subr.mxu0 %v538_v28  ;;  %1749 = vmatpush3.msra.mxu1 %v728_v56 }
 0x124   : > { %1722 = vmatpush3.msra.mxu0 %v538_v28  ;;  %1750 = vmatprep.subr.mxu1 %v727_v57 }
 0x125   : > { %1723 = vmatprep.subr.mxu0 %v537_v29  ;;  %1751 = vmatpush3.msra.mxu1 %v727_v57  ;;  %v666_v57 = vld [vmem:[#allocation6 + $0x1] sm:$0x1] }
 0x126   : > { %1724 = vmatpush3.msra.mxu0 %v537_v29  ;;  %1752 = vmatprep.subr.mxu1 %v726_v58 }
 0x127   : > { %1725 = vmatprep.subr.mxu0 %v536_v30  ;;  %1753 = vmatpush3.msra.mxu1 %v726_v58 }
 0x128   : > { %1726 = vmatpush3.msra.mxu0 %v536_v30  ;;  %1754 = vmatprep.subr.mxu1 %v725_v59 }
 0x129   : > { %1727 = vmatprep.subr.mxu0 %v535_v31  ;;  %1755 = vmatpush3.msra.mxu1 %v725_v59 }
 0x12a   : > { %1728 = vmatpush3.msra.mxu0 %v535_v31  ;;  %1756 = vmatprep.subr.mxu1 %v724_v61 }
 0x12b   : > { %1729 = vmatprep.subr.mxu0 %v534_v32  ;;  %1757 = vmatpush3.msra.mxu1 %v724_v61 }
 0x12c   : > { %1730 = vmatpush3.msra.mxu0 %v534_v32  ;;  %1758 = vmatprep.subr.mxu1 %v723_v63 }
 0x12d   : > { %1731 = vmatprep.subr.mxu0 %v533_v33  ;;  %1759 = vmatpush3.msra.mxu1 %v723_v63 }
 0x12e   : > { %1732 = vmatpush3.msra.mxu0 %v533_v33  ;;  %1760 = vmatprep.subr.mxu1 %v722_v3 }
 0x12f   : > { %1733 = vmatprep.subr.mxu0 %v532_v34  ;;  %1761 = vmatpush3.msra.mxu1 %v722_v3 }
 0x130   : > { %1734 = vmatpush3.msra.mxu0 %v532_v34  ;;  %1762 = vmatprep.subr.mxu1 %v721_v5 }
 0x131   : > { %1735 = vmatprep.subr.mxu0 %v531_v35  ;;  %1763 = vmatpush3.msra.mxu1 %v721_v5 }
 0x132   : > { %1736 = vmatpush3.msra.mxu0 %v531_v35  ;;  %1764 = vmatprep.subr.mxu1 %v720_v8 }
 0x133   : > { %1737 = vmatprep.subr.mxu0 %v530_v36  ;;  %1765 = vmatpush3.msra.mxu1 %v720_v8 }
 0x134   : > { %1738 = vmatpush3.msra.mxu0 %v530_v36  ;;  %1766 = vmatprep.subr.mxu1 %v719_v10 }
 0x135   : > { %1739 = vmatprep.subr.mxu0 %v529_v37  ;;  %1767 = vmatpush3.msra.mxu1 %v719_v10  ;;  %v897_v10 = vld [vmem:[#allocation8 + $0x2f0] sm:$0xff] }
 0x136   : > { %1740 = vmatpush3.msra.mxu0 %v529_v37  ;;  %1768 = vmatprep.subr.mxu1 %v718_v12 }
 0x137   : > { %1741 = vmatprep.subr.mxu0 %v528_v38  ;;  %1769 = vmatpush3.msra.mxu1 %v718_v12  ;;  %v895_v12 = vld [vmem:[#allocation8 + $0x2e0] sm:$0xff] }
 0x138   : > { %1742 = vmatpush3.msra.mxu0 %v528_v38  ;;  %1770 = vmatprep.subr.mxu1 %v717_v14 }
 0x139   : > { %1744 = vmatmul.mubr.f32.vlgmr.msra.gmra.mxu0 %v526_v39  ;;  %1781 = vmatprep.subr.mxu0 %v710_v60 }
 0x13a   : > { %1782 = vmatpush3.msra.mxu0 %v710_v60  ;;  %1771 = vmatpush3.msra.mxu1 %v717_v14  ;;  %v1466_v60 = vld [vmem:[%s2504_s2 + $0x1] sm:$0x1] }
 0x13b   : > { %1783 = vmatprep.subr.mxu0 %v709_v62  ;;  %1772 = vmatprep.subr.mxu1 %v716_v16 }
 0x13c   : > { %1784 = vmatpush3.msra.mxu0 %v709_v62  ;;  %1773 = vmatpush3.msra.mxu1 %v716_v16  ;;  %v892_v16 = vld [vmem:[#allocation8 + $0x2c8] sm:$0xff] }
 0x13d   : > { %1785 = vmatprep.subr.mxu0 %v708_v2  ;;  %1774 = vmatprep.subr.mxu1 %v715_v18 }
 0x13e   : > { %1786 = vmatpush3.msra.mxu0 %v708_v2  ;;  %1775 = vmatpush3.msra.mxu1 %v715_v18  ;;  %v890_v18 = vld [vmem:[#allocation8 + $0x2b8] sm:$0xff] }
 0x13f   : > { %1787 = vmatprep.subr.mxu0 %v707_v4  ;;  %1776 = vmatprep.subr.mxu1 %v714_v20 }
 0x140   : > { %1788 = vmatpush3.msra.mxu0 %v707_v4  ;;  %1777 = vmatpush3.msra.mxu1 %v714_v20  ;;  %v888_v20 = vld [vmem:[#allocation8 + $0x2a8] sm:$0xff] }
 0x141   : > { %1789 = vmatprep.subr.mxu0 %v706_v6  ;;  %1816 = vmatprep.subr.mxu1 %v898_v22 }
 0x142   : > { %1790 = vmatpush3.msra.mxu0 %v706_v6 }
 0x143   : > { %1791 = vmatprep.subr.mxu0 %v705_v9 }
 0x144   : > { %1792 = vmatpush3.msra.mxu0 %v705_v9 }
 0x145   : > { %1793 = vmatprep.subr.mxu0 %v704_v11 }
 0x146   : > { %1794 = vmatpush3.msra.mxu0 %v704_v11  ;;  %v896_v11 = vld [vmem:[#allocation8 + $0x2e8] sm:$0xff] }
 0x147   : > { %1795 = vmatprep.subr.mxu0 %v703_v13 }
 0x148   : > { %1796 = vmatpush3.msra.mxu0 %v703_v13 }
 0x149   : > { %1797 = vmatprep.subr.mxu0 %v702_v15 }
 0x14a   : > { %1798 = vmatpush3.msra.mxu0 %v702_v15  ;;  %v893_v15 = vld [vmem:[#allocation8 + $0x2d0] sm:$0xff] }
 0x14b   : > { %1799 = vmatprep.subr.mxu0 %v701_v17 }
 0x14c   : > { %1800 = vmatpush3.msra.mxu0 %v701_v17  ;;  %v891_v17 = vld [vmem:[#allocation8 + $0x2c0] sm:$0xff] }
 0x14d   : > { %1801 = vmatprep.subr.mxu0 %v700_v19 }
 0x14e   : > { %1802 = vmatpush3.msra.mxu0 %v700_v19  ;;  %v889_v19 = vld [vmem:[#allocation8 + $0x2b0] sm:$0xff] }
 0x14f   : > { %1803 = vmatprep.subr.mxu0 %v699_v21 }
 0x150   : > { %1804 = vmatpush3.msra.mxu0 %v699_v21  ;;  %v887_v21 = vld [vmem:[#allocation8 + $0x2a0] sm:$0xff] }
 0x151   : > { %1805 = vmatprep.subr.mxu0 %v698_v23 }
 0x152   : > { %1806 = vmatpush3.msra.mxu0 %v698_v23  ;;  %v885_v23 = vld [vmem:[#allocation8 + $0x290] sm:$0xff] }
 0x153   : > { %1807 = vmatprep.subr.mxu0 %v697_v24 }
 0x154   : > { %1808 = vmatpush3.msra.mxu0 %v697_v24  ;;  %v884_v24 = vld [vmem:[#allocation8 + $0x288] sm:$0xff] }
 0x155   : > { %1809 = vmatprep.subr.mxu0 %v696_v25 }
 0x156   : > { %1810 = vmatpush3.msra.mxu0 %v696_v25  ;;  %v883_v25 = vld [vmem:[#allocation8 + $0x280] sm:$0xff] }
 0x157   : > { %1811 = vmatprep.subr.mxu0 %v695_v26 }
 0x158   : > { %1812 = vmatpush3.msra.mxu0 %v695_v26 }
 0x1d8   : > { %v1675_v40 = vpop.f32.mrf.mxu0 }
 0x1da   : > { %v441_v42 = vpop.f32.mrf.mxu0 }
 0x1e0   : > { %v1710_v41 = vpop.f32.mrf.mxu1 }
 0x1e1   : > { %v522_v44 = vadd.f32 %v1710_v41, %v1675_v40 }
 0x1e2   : > { %v516_v43 = vpop.f32.mrf.mxu1 }
 0x1e3   : > { %v517_v47 = vadd.f32 %v516_v43, %v441_v42 }
 0x1f9   : > { %v1745_v45 = vpop.f32.mrf.mxu0 }
 0x1fa   : > { %v620_v48 = vadd.f32 %v1745_v45, %v522_v44 }
 0x1fb   : > { %v610_v49 = vpop.f32.mrf.mxu0 }
 0x1fc   : > { %v2407_v50 = vadd.f32 %v1465_v46, %v620_v48  ;;  %v619_v51 = vadd.f32 %v610_v49, %v517_v47 }
 0x1fe   : > { %v2409_v52 = vadd.f32 %v1465_v46, %v619_v51  ;;  %632 = vadd.xlane.f32.xlu1 %v2407_v50  ;;  %v645_v53 = vmul.f32 %v2407_v50, %v2407_v50 }
 0x200   : > { %630 = vadd.xlane.f32.xlu0 %v2409_v52  ;;  %v644_v54 = vmul.f32 %v2409_v52, %v2409_v52 }
 0x202   : > { %648 = vadd.xlane.f32.xlu1 %v645_v53 }
 0x204   : > { %646 = vadd.xlane.f32.xlu0 %v644_v54 }
 0x287   : > { %v633_v27 = vpop.xlane.xlu1 %632 }
 0x288   : > { %v635_v29 = vmul.f32 0.0078125, %v633_v27 }
 0x289   : > { %v631_v28 = vpop.xlane.xlu0 %630 }
 0x28a   : > { %v634_v30 = vmul.f32 0.0078125, %v631_v28 }
 0x28b   : > { %v649_v31 = vpop.xlane.xlu1 %648 }
 0x28c   : > { %v636_v32 = vadd.f32 %v635_v29, %v634_v30  ;;  %v651_v35 = vmul.f32 0.0078125, %v649_v31 }
 0x28d   : > { %v647_v33 = vpop.xlane.xlu0 %646 }
 0x28e   : > { %v637_v34 = vrot.slane %v636_v32, 4  ;;  %v650_v36 = vmul.f32 0.0078125, %v647_v33  ;;  %v1468_v33 = vld [vmem:[%s2506_s4 + $0x1] ss:$0 sm:$0xff] }
 0x290   : > { %v638_v37 = vadd.f32 %v637_v34, %v636_v32  ;;  %v652_v38 = vadd.f32 %v651_v35, %v650_v36 }
 0x292   : > { %v639_v39 = vrot.slane %v638_v37, 2  ;;  %v653_v40 = vrot.slane %v652_v38, 4 }
 0x294   : > { %v640_v41 = vadd.f32 %v639_v39, %v638_v37  ;;  %v654_v42 = vadd.f32 %v653_v40, %v652_v38 }
 0x296   : > { %v641_v43 = vrot.slane %v640_v41, 1  ;;  %v655_v44 = vrot.slane %v654_v42, 2 }
 0x298   : > { %v642_v45 = vadd.f32 %v641_v43, %v640_v41  ;;  %v656_v46 = vadd.f32 %v655_v44, %v654_v42  ;;  %v1085_v44 = vld [vmem:[#allocation8 + $0x3f8] sm:$0xff] }
 0x299   : > { %1851 = vmatprep.subr.mxu0 %v1085_v44 }
 0x29a   : > { %v643_v47 = vmul.f32 0.0625, %v642_v45  ;;  %v657_v48 = vrot.slane %v656_v46, 1  ;;  %v1082_v45 = vld [vmem:[#allocation8 + $0x3e0] sm:$0xff] }
 0x29c   : > { %v658_v49 = vadd.f32 %v657_v48, %v656_v46  ;;  %v660_v51 = vmul.f32 %v643_v47, %v643_v47  ;;  %v1081_v46 = vld [vmem:[#allocation8 + $0x3d8] sm:$0xff]  ;;  %v1080_v48 = vld [vmem:[#allocation8 + $0x3d0] sm:$0xff] }
 0x29e   : > { %v659_v53 = vmul.f32 0.0625, %v658_v49  ;;  %v1065_v49 = vld [vmem:[#allocation8 + $0x370] sm:$0xff] }
 0x2a0   : > { %v661_v54 = vsub.f32 %v659_v53, %v660_v51  ;;  %v1079_v51 = vld [vmem:[#allocation8 + $0x3c8] sm:$0xff] }
 0x2a1   : > { %v1064_v53 = vld [vmem:[#allocation8 + $0x368] sm:$0xff] }
 0x2a2   : > { %v662_v55 = vmax.f32 %v661_v54, 0.0  ;;  %v1078_v54 = vld [vmem:[#allocation8 + $0x3c0] sm:$0xff] }
 0x2a4   : > { %v663_v56 = vadd.f32 1e-05, %v662_v55  ;;  %v1063_v55 = vld [vmem:[#allocation8 + $0x360] sm:$0xff] }
 0x2a6   : > { %2032 = vrsqrt.f32 %v663_v56  ;;  %v1077_v56 = vld [vmem:[#allocation8 + $0x3b8] sm:$0xff] }
 0x2b3   : > { %v2033_v58 = vpop.eup %2032 }
 0x2b4   : > { %v669_v59 = vmul.f32 %v2033_v58, %v666_v57  ;;  %v1062_v57 = vld [vmem:[#allocation8 + $0x358] sm:$0xff]  ;;  %v1076_v58 = vld [vmem:[#allocation8 + $0x3b0] sm:$0xff] }
 0x2b6   : > { %v670_v61 = vmul.f32 %v669_v59, %v643_v47  ;;  %v676_v62 = vrot.slane %v669_v59, %v2394_v7  ;;  %v1066_v47 = vld [vmem:[#allocation8 + $0x378] sm:$0xff]  ;;  %v1061_v59 = vld [vmem:[#allocation8 + $0x350] sm:$0xff] }
 0x2b8   : > { %v671_v63 = vsub.f32 %v1466_v60, %v670_v61  ;;  %v678_v2 = vmul.f32 %v676_v62, %v2409_v52  ;;  %v679_v3 = vmul.f32 %v676_v62, %v2407_v50  ;;  %v894_v52 = vld [vmem:[#allocation8 + $0x2d8] sm:$0xff]  ;;  %v1075_v60 = vld [vmem:[#allocation8 + $0x3a8] sm:$0xff]  ;;  %v1074_v62 = vld [vmem:[#allocation8 + $0x3a0] sm:$0xff] }
 0x2b9   : > { %v1060_v61 = vld [vmem:[#allocation8 + $0x348] sm:$0xff] }
 0x2ba   : > { %v684_v4 = vrot.slane %v671_v63, %v2394_v7  ;;  %v1059_v63 = vld [vmem:[#allocation8 + $0x340] sm:$0xff] }
 0x2bc   : > { %v686_v5 = vadd.f32 %v684_v4, %v678_v2  ;;  %v687_v6 = vadd.f32 %v684_v4, %v679_v3  ;;  %v1073_v2 = vld [vmem:[#allocation8 + $0x398] sm:$0xff]  ;;  %v1072_v4 = vld [vmem:[#allocation8 + $0x390] sm:$0xff] }
 0x2bd   : > { %v1058_v3 = vld [vmem:[#allocation8 + $0x338] sm:$0xff] }
 0x2be   : > { %v688_v8 = vmax.f32 %v686_v5, 0.0  ;;  %v689_v9 = vmax.f32 %v687_v6, 0.0  ;;  %v1057_v5 = vld [vmem:[#allocation8 + $0x330] sm:$0xff]  ;;  %v1071_v6 = vld [vmem:[#allocation8 + $0x388] sm:$0xff] }
 0x2c0   : > { %690 = vst [vmem:[#allocation2 + $0x1] sm:$0xff] %v688_v8  ;;  %691 = vst [vmem:[#allocation2 + $0x9] sm:$0xff] %v689_v9  ;;  %1778 = vmatprep.mubr.f32.mxu1 %v688_v8  ;;  %v1056_v8 = vld [vmem:[#allocation8 + $0x328] sm:$0xff] }
 0x2c1   : > { %1779 = vmatmul.mubr.f32.vlgmr.msra.gmra.mxu1 %v689_v9  ;;  %v1070_v9 = vld [vmem:[#allocation8 + $0x380] sm:$0xff] }
 0x2c2   : > { %1817 = vmatpush3.msra.mxu1 %v898_v22  ;;  %v886_v22 = vld [vmem:[#allocation8 + $0x298] sm:$0xff] }
 0x2c3   : > { %1818 = vmatprep.subr.mxu1 %v897_v10 }
 0x2c4   : > { %1819 = vmatpush3.msra.mxu1 %v897_v10  ;;  %v1055_v10 = vld [vmem:[#allocation8 + $0x320] sm:$0xff] }
 0x2c5   : > { %1820 = vmatprep.subr.mxu1 %v896_v11 }
 0x2c6   : > { %1821 = vmatpush3.msra.mxu1 %v896_v11  ;;  %v1254_v11 = vld [vmem:[#allocation8 + $0x478] sm:$0xff] }
 0x2c7   : > { %v692_v50 = vld [vmem:[#allocation2] sm:$0xff]  ;;  %v693_v13 = vld [vmem:[#allocation2 + $0x8] sm:$0xff]  ;;  %1822 = vmatprep.subr.mxu1 %v895_v12 }
 0x2c8   : > { %v880_v14 = vld [vmem:[#allocation2 + $0x2] sm:$0xff]  ;;  %1813 = vmatprep.mubr.f32.mxu0 %v692_v50  ;;  %1823 = vmatpush3.msra.mxu1 %v895_v12  ;;  %v881_v26 = vld [vmem:[#allocation2 + $0xa] sm:$0xff]  ;;  %v1054_v12 = vld [vmem:[#allocation8 + $0x318] sm:$0xff] }
 0x2c9   : > { %1848 = vmatprep.mubr.f32.mxu1 %v880_v14  ;;  %1814 = vmatmul.mubr.f32.vlgmr.msra.gmra.mxu0 %v693_v13  ;;  %v1052_v50 = vld [vmem:[#allocation8 + $0x308] sm:$0xff]  ;;  %v1051_v13 = vld [vmem:[#allocation8 + $0x300] sm:$0xff] }
 0x2ca   : > { %1824 = vmatprep.subr.mxu1 %v894_v52  ;;  %1852 = vmatpush3.msra.mxu0 %v1085_v44  ;;  %v1024_v44 = vld [vmem:[#allocation6 + $0x2] sm:$0x1] }
 0x2cb   : > { %1825 = vmatpush3.msra.mxu1 %v894_v52  ;;  %v1053_v52 = vld [vmem:[#allocation8 + $0x310] sm:$0xff] }
 0x2cc   : > { %1826 = vmatprep.subr.mxu1 %v893_v15 }
 0x2cd   : > { %1827 = vmatpush3.msra.mxu1 %v893_v15 }
 0x2ce   : > { %1828 = vmatprep.subr.mxu1 %v892_v16 }
 0x2cf   : > { %1829 = vmatpush3.msra.mxu1 %v892_v16 }
 0x2d0   : > { %1830 = vmatprep.subr.mxu1 %v891_v17 }
 0x2d1   : > { %1831 = vmatpush3.msra.mxu1 %v891_v17 }
 0x2d2   : > { %1832 = vmatprep.subr.mxu1 %v890_v18 }
 0x2d3   : > { %1833 = vmatpush3.msra.mxu1 %v890_v18 }
 0x2d4   : > { %1834 = vmatprep.subr.mxu1 %v889_v19 }
 0x2d5   : > { %1835 = vmatpush3.msra.mxu1 %v889_v19 }
 0x2d6   : > { %1836 = vmatprep.subr.mxu1 %v888_v20 }
 0x2d7   : > { %1837 = vmatpush3.msra.mxu1 %v888_v20 }
 0x2d8   : > { %1838 = vmatprep.subr.mxu1 %v887_v21 }
 0x2d9   : > { %1839 = vmatpush3.msra.mxu1 %v887_v21 }
 0x2da   : > { %1840 = vmatprep.subr.mxu1 %v886_v22 }
 0x2db   : > { %1841 = vmatpush3.msra.mxu1 %v886_v22 }
 0x2dc   : > { %1842 = vmatprep.subr.mxu1 %v885_v23 }
 0x2dd   : > { %1843 = vmatpush3.msra.mxu1 %v885_v23 }
 0x2de   : > { %1844 = vmatprep.subr.mxu1 %v884_v24 }
 0x2df   : > { %1845 = vmatpush3.msra.mxu1 %v884_v24 }
 0x2e0   : > { %1846 = vmatprep.subr.mxu1 %v883_v25 }
 0x2e1   : > { %1847 = vmatpush3.msra.mxu1 %v883_v25 }
 0x2e2   : > { %1849 = vmatmul.mubr.f32.vlgmr.msra.gmra.mxu1 %v881_v26  ;;  %1886 = vmatprep.subr.mxu1 %v1066_v47 }
 0x2e3   : > { %1887 = vmatpush3.msra.mxu1 %v1066_v47 }
 0x2e4   : > { %1888 = vmatprep.subr.mxu1 %v1065_v49 }
 0x2e5   : > { %1889 = vmatpush3.msra.mxu1 %v1065_v49 }
 0x2e6   : > { %1890 = vmatprep.subr.mxu1 %v1064_v53 }
 0x2e7   : > { %1891 = vmatpush3.msra.mxu1 %v1064_v53 }
 0x2e8   : > { %1892 = vmatprep.subr.mxu1 %v1063_v55 }
 0x2e9   : > { %1893 = vmatpush3.msra.mxu1 %v1063_v55 }
 0x2ea   : > { %1894 = vmatprep.subr.mxu1 %v1062_v57 }
 0x2eb   : > { %1895 = vmatpush3.msra.mxu1 %v1062_v57  ;;  %v1252_v57 = vld [vmem:[#allocation8 + $0x468] sm:$0xff] }
 0x2ec   : > { %1896 = vmatprep.subr.mxu1 %v1061_v59 }
 0x2ed   : > { %1897 = vmatpush3.msra.mxu1 %v1061_v59  ;;  %v1250_v59 = vld [vmem:[#allocation8 + $0x458] sm:$0xff] }
 0x2ee   : > { %1898 = vmatprep.subr.mxu1 %v1060_v61 }
 0x2ef   : > { %1899 = vmatpush3.msra.mxu1 %v1060_v61 }
 0x2f0   : > { %1900 = vmatprep.subr.mxu1 %v1059_v63 }
 0x2f1   : > { %1901 = vmatpush3.msra.mxu1 %v1059_v63  ;;  %v1248_v63 = vld [vmem:[#allocation8 + $0x448] sm:$0xff] }
 0x2f2   : > { %1902 = vmatprep.subr.mxu1 %v1058_v3 }
 0x2f3   : > { %1903 = vmatpush3.msra.mxu1 %v1058_v3  ;;  %v1246_v3 = vld [vmem:[#allocation8 + $0x438] sm:$0xff] }
 0x2f4   : > { %1904 = vmatprep.subr.mxu1 %v1057_v5 }
 0x2f5   : > { %1905 = vmatpush3.msra.mxu1 %v1057_v5  ;;  %v1244_v5 = vld [vmem:[#allocation8 + $0x428] sm:$0xff] }
 0x2f6   : > { %1906 = vmatprep.subr.mxu1 %v1056_v8 }
 0x2f7   : > { %1907 = vmatpush3.msra.mxu1 %v1056_v8  ;;  %v1242_v8 = vld [vmem:[#allocation8 + $0x418] sm:$0xff] }
 0x2f8   : > { %1908 = vmatprep.subr.mxu1 %v1055_v10 }
 0x2f9   : > { %1909 = vmatpush3.msra.mxu1 %v1055_v10  ;;  %v1240_v10 = vld [vmem:[#allocation8 + $0x408] sm:$0xff] }
 0x2fa   : > { %1910 = vmatprep.subr.mxu1 %v1054_v12 }
 0x2fb   : > { %1911 = vmatpush3.msra.mxu1 %v1054_v12 }
 0x2fc   : > { %1912 = vmatprep.subr.mxu1 %v1053_v52 }
 0x2fd   : > { %1913 = vmatpush3.msra.mxu1 %v1053_v52 }
 0x2fe   : > { %1914 = vmatprep.subr.mxu1 %v1052_v50 }
 0x2ff   : > { %1915 = vmatpush3.msra.mxu1 %v1052_v50 }
 0x300   : > { %1916 = vmatprep.subr.mxu1 %v1051_v13 }
 0x301   : > { %1917 = vmatpush3.msra.mxu1 %v1051_v13 }
 0x381   : > { %v1780_v27 = vpop.f32.mrf.mxu1 }
 0x383   : > { %v796_v29 = vpop.f32.mrf.mxu1 }
 0x389   : > { %v1815_v28 = vpop.f32.mrf.mxu0 }
 0x38a   : > { %v877_v31 = vadd.f32 %v1815_v28, %v1780_v27 }
 0x38b   : > { %v871_v30 = vpop.f32.mrf.mxu0 }
 0x38c   : > { %v872_v34 = vadd.f32 %v871_v30, %v796_v29 }
 0x3a2   : > { %v1850_v32 = vpop.f32.mrf.mxu1 }
 0x3a3   : > { %v975_v35 = vadd.f32 %v1850_v32, %v877_v31 }
 0x3a4   : > { %v965_v36 = vpop.f32.mrf.mxu1 }
 0x3a5   : > { %v985_v37 = vadd.f32 %v1468_v33, %v975_v35  ;;  %v974_v38 = vadd.f32 %v965_v36, %v872_v34 }
 0x3a7   : > { %v2428_v39 = vadd.f32 %v985_v37, %v2383_v1  ;;  %v984_v40 = vadd.f32 %v1468_v33, %v974_v38  ;;  %v1084_v1 = vld [vmem:[#allocation8 + $0x3f0] sm:$0xff] }
 0x3a8   : > { %1853 = vmatprep.subr.mxu0 %v1084_v1 }
 0x3a9   : > { %v2431_v41 = vadd.f32 %v984_v40, %v2381_v0  ;;  %990 = vadd.xlane.f32.xlu1 %v2428_v39  ;;  %v1003_v42 = vmul.f32 %v2428_v39, %v2428_v39  ;;  %1854 = vmatpush3.msra.mxu0 %v1084_v1  ;;  %v1083_v0 = vld [vmem:[#allocation8 + $0x3e8] sm:$0xff] }
 0x3aa   : > { %1855 = vmatprep.subr.mxu0 %v1083_v0 }
 0x3ab   : > { %988 = vadd.xlane.f32.xlu0 %v2431_v41  ;;  %v1002_v43 = vmul.f32 %v2431_v41, %v2431_v41  ;;  %1856 = vmatpush3.msra.mxu0 %v1083_v0 }
 0x3ac   : > { %1857 = vmatprep.subr.mxu0 %v1082_v45 }
 0x3ad   : > { %1006 = vadd.xlane.f32.xlu1 %v1003_v42  ;;  %1858 = vmatpush3.msra.mxu0 %v1082_v45  ;;  %v1469_v45 = vld [vmem:[%s2504_s2 + $0x2] sm:$0x1] }
 0x3ae   : > { %1859 = vmatprep.subr.mxu0 %v1081_v46 }
 0x3af   : > { %1004 = vadd.xlane.f32.xlu0 %v1002_v43  ;;  %1860 = vmatpush3.msra.mxu0 %v1081_v46 }
 0x3b0   : > { %1861 = vmatprep.subr.mxu0 %v1080_v48 }
 0x3b1   : > { %1862 = vmatpush3.msra.mxu0 %v1080_v48 }
 0x3b2   : > { %1863 = vmatprep.subr.mxu0 %v1079_v51 }
 0x3b3   : > { %1864 = vmatpush3.msra.mxu0 %v1079_v51 }
 0x3b4   : > { %1865 = vmatprep.subr.mxu0 %v1078_v54 }
 0x3b5   : > { %1866 = vmatpush3.msra.mxu0 %v1078_v54 }
 0x3b6   : > { %1867 = vmatprep.subr.mxu0 %v1077_v56 }
 0x3b7   : > { %1868 = vmatpush3.msra.mxu0 %v1077_v56  ;;  %v1253_v56 = vld [vmem:[#allocation8 + $0x470] sm:$0xff] }
 0x3b8   : > { %1869 = vmatprep.subr.mxu0 %v1076_v58 }
 0x3b9   : > { %1870 = vmatpush3.msra.mxu0 %v1076_v58  ;;  %v1251_v58 = vld [vmem:[#allocation8 + $0x460] sm:$0xff] }
 0x3ba   : > { %1871 = vmatprep.subr.mxu0 %v1075_v60 }
 0x3bb   : > { %1872 = vmatpush3.msra.mxu0 %v1075_v60 }
 0x3bc   : > { %1873 = vmatprep.subr.mxu0 %v1074_v62 }
 0x3bd   : > { %1874 = vmatpush3.msra.mxu0 %v1074_v62 }
 0x3be   : > { %1875 = vmatprep.subr.mxu0 %v1073_v2 }
 0x3bf   : > { %1876 = vmatpush3.msra.mxu0 %v1073_v2  ;;  %v1247_v2 = vld [vmem:[#allocation8 + $0x440] sm:$0xff] }
 0x3c0   : > { %1877 = vmatprep.subr.mxu0 %v1072_v4 }
 0x3c1   : > { %1878 = vmatpush3.msra.mxu0 %v1072_v4  ;;  %v1245_v4 = vld [vmem:[#allocation8 + $0x430] sm:$0xff] }
 0x3c2   : > { %1879 = vmatprep.subr.mxu0 %v1071_v6 }
 0x3c3   : > { %1880 = vmatpush3.msra.mxu0 %v1071_v6  ;;  %v1243_v6 = vld [vmem:[#allocation8 + $0x420] sm:$0xff] }
 0x3c4   : > { %1881 = vmatprep.subr.mxu0 %v1070_v9 }
 0x3c5   : > { %1882 = vmatpush3.msra.mxu0 %v1070_v9  ;;  %v1241_v9 = vld [vmem:[#allocation8 + $0x410] sm:$0xff] }
 0x3c6   : > { %1921 = vmatprep.subr.mxu0 %v1254_v11 }
 0x432   : > { %v991_v14 = vpop.xlane.xlu1 %990 }
 0x433   : > { %v993_v16 = vmul.f32 0.0078125, %v991_v14 }
 0x434   : > { %v989_v15 = vpop.xlane.xlu0 %988 }
 0x435   : > { %v992_v17 = vmul.f32 0.0078125, %v989_v15 }
 0x436   : > { %v1007_v18 = vpop.xlane.xlu1 %1006 }
 0x437   : > { %v994_v19 = vadd.f32 %v993_v16, %v992_v17  ;;  %v1009_v22 = vmul.f32 0.0078125, %v1007_v18  ;;  %v1471_v17 = vld [vmem:[%s2506_s4 + $0x2] ss:$0 sm:$0xff] }
 0x438   : > { %v1005_v20 = vpop.xlane.xlu0 %1004 }
 0x439   : > { %v995_v21 = vrot.slane %v994_v19, 4  ;;  %v1008_v23 = vmul.f32 0.0078125, %v1005_v20 }
 0x43b   : > { %v996_v24 = vadd.f32 %v995_v21, %v994_v19  ;;  %v1010_v25 = vadd.f32 %v1009_v22, %v1008_v23 }
 0x43d   : > { %v997_v26 = vrot.slane %v996_v24, 2  ;;  %v1011_v27 = vrot.slane %v1010_v25, 4 }
 0x43f   : > { %v998_v28 = vadd.f32 %v997_v26, %v996_v24  ;;  %v1012_v29 = vadd.f32 %v1011_v27, %v1010_v25 }
 0x441   : > { %v999_v30 = vrot.slane %v998_v28, 1  ;;  %v1013_v31 = vrot.slane %v1012_v29, 2 }
 0x443   : > { %v1000_v32 = vadd.f32 %v999_v30, %v998_v28  ;;  %v1014_v33 = vadd.f32 %v1013_v31, %v1012_v29 }
 0x445   : > { %v1001_v34 = vmul.f32 0.0625, %v1000_v32  ;;  %v1015_v35 = vrot.slane %v1014_v33, 1 }
 0x447   : > { %v1016_v36 = vadd.f32 %v1015_v35, %v1014_v33  ;;  %v1018_v37 = vmul.f32 %v1001_v34, %v1001_v34 }
 0x449   : > { %v1017_v38 = vmul.f32 0.0625, %v1016_v36 }
 0x44b   : > { %v1019_v40 = vsub.f32 %v1017_v38, %v1018_v37 }
 0x44d   : > { %v1020_v42 = vmax.f32 %v1019_v40, 0.0 }
 0x44f   : > { %v1021_v43 = vadd.f32 1e-05, %v1020_v42 }
 0x451   : > { %2034 = vrsqrt.f32 %v1021_v43 }
 0x45e   : > { %v2035_v1 = vpop.eup %2034 }
 0x45f   : > { %v1027_v0 = vmul.f32 %v2035_v1, %v1024_v44 }
 0x461   : > { %v1028_v46 = vmul.f32 %v1027_v0, %v1001_v34  ;;  %v1034_v47 = vrot.slane %v1027_v0, %v2394_v7 }
 0x463   : > { %v1029_v48 = vsub.f32 %v1469_v45, %v1028_v46  ;;  %v1036_v49 = vmul.f32 %v1034_v47, %v2431_v41  ;;  %v1037_v51 = vmul.f32 %v1034_v47, %v2428_v39 }
 0x465   : > { %v1042_v53 = vrot.slane %v1029_v48, %v2394_v7  ;;  %v1249_v7 = vld [vmem:[#allocation8 + $0x450] sm:$0xff] }
 0x467   : > { %v1044_v54 = vadd.f32 %v1042_v53, %v1036_v49  ;;  %v1045_v55 = vadd.f32 %v1042_v53, %v1037_v51 }
 0x469   : > { %1046 = vst [vmem:[#allocation2 + $0x1] sm:$0xff] %v1044_v54  ;;  %1047 = vst [vmem:[#allocation2 + $0x9] sm:$0xff] %v1045_v55  ;;  %1883 = vmatprep.mubr.f32.mxu0 %v1044_v54 }
 0x46a   : > { %1884 = vmatmul.mubr.f32.vlgmr.msra.gmra.mxu0 %v1045_v55 }
 0x46b   : > { %1922 = vmatpush3.msra.mxu0 %v1254_v11  ;;  %v1239_v11 = vld [vmem:[#allocation8 + $0x400] sm:$0xff] }
 0x46c   : > { %1923 = vmatprep.subr.mxu0 %v1253_v56 }
 0x46d   : > { %1924 = vmatpush3.msra.mxu0 %v1253_v56 }
 0x46e   : > { %1925 = vmatprep.subr.mxu0 %v1252_v57 }
 0x46f   : > { %1926 = vmatpush3.msra.mxu0 %v1252_v57 }
 0x470   : > { %v1048_v60 = vld [vmem:[#allocation2] sm:$0xff]  ;;  %v1049_v61 = vld [vmem:[#allocation2 + $0x8] sm:$0xff]  ;;  %1927 = vmatprep.subr.mxu0 %v1251_v58 }
 0x471   : > { %v1236_v62 = vld [vmem:[#allocation2 + $0x2] sm:$0xff]  ;;  %1918 = vmatprep.mubr.f32.mxu1 %v1048_v60  ;;  %1928 = vmatpush3.msra.mxu0 %v1251_v58  ;;  %v1237_v12 = vld [vmem:[#allocation2 + $0xa] sm:$0xff] }
 0x472   : > { %1953 = vmatprep.mubr.f32.mxu0 %v1236_v62  ;;  %1919 = vmatmul.mubr.f32.vlgmr.msra.gmra.mxu1 %v1049_v61 }
 0x473   : > { %1929 = vmatprep.subr.mxu0 %v1250_v59 }
 0x474   : > { %1930 = vmatpush3.msra.mxu0 %v1250_v59 }
 0x475   : > { %1931 = vmatprep.subr.mxu0 %v1249_v7 }
 0x476   : > { %1932 = vmatpush3.msra.mxu0 %v1249_v7 }
 0x477   : > { %1933 = vmatprep.subr.mxu0 %v1248_v63 }
 0x478   : > { %1934 = vmatpush3.msra.mxu0 %v1248_v63 }
 0x479   : > { %1935 = vmatprep.subr.mxu0 %v1247_v2 }
 0x47a   : > { %1936 = vmatpush3.msra.mxu0 %v1247_v2 }
 0x47b   : > { %1937 = vmatprep.subr.mxu0 %v1246_v3 }
 0x47c   : > { %1938 = vmatpush3.msra.mxu0 %v1246_v3 }
 0x47d   : > { %1939 = vmatprep.subr.mxu0 %v1245_v4 }
 0x47e   : > { %1940 = vmatpush3.msra.mxu0 %v1245_v4 }
 0x47f   : > { %1941 = vmatprep.subr.mxu0 %v1244_v5 }
 0x480   : > { %1942 = vmatpush3.msra.mxu0 %v1244_v5 }
 0x481   : > { %1943 = vmatprep.subr.mxu0 %v1243_v6 }
 0x482   : > { %1944 = vmatpush3.msra.mxu0 %v1243_v6 }
 0x483   : > { %1945 = vmatprep.subr.mxu0 %v1242_v8 }
 0x484   : > { %1946 = vmatpush3.msra.mxu0 %v1242_v8 }
 0x485   : > { %1947 = vmatprep.subr.mxu0 %v1241_v9 }
 0x486   : > { %1948 = vmatpush3.msra.mxu0 %v1241_v9 }
 0x487   : > { %1949 = vmatprep.subr.mxu0 %v1240_v10 }
 0x488   : > { %1950 = vmatpush3.msra.mxu0 %v1240_v10 }
 0x489   : > { %1951 = vmatprep.subr.mxu0 %v1239_v11 }
 0x48a   : > { %1952 = vmatpush3.msra.mxu0 %v1239_v11 }
 0x48b   : > { %1954 = vmatmul.mubr.f32.vlgmr.msra.gmra.mxu0 %v1237_v12 }
 0x52a   : > { %v1885_v52 = vpop.f32.mrf.mxu0 }
 0x52c   : > { %v1152_v13 = vpop.f32.mrf.mxu0 }
 0x532   : > { %v1920_v50 = vpop.f32.mrf.mxu1 }
 0x533   : > { %v1233_v15 = vadd.f32 %v1920_v50, %v1885_v52 }
 0x534   : > { %v1227_v14 = vpop.f32.mrf.mxu1 }
 0x535   : > { %v1228_v18 = vadd.f32 %v1227_v14, %v1152_v13 }
 0x54b   : > { %v1955_v16 = vpop.f32.mrf.mxu0 }
 0x54c   : > { %v1331_v19 = vadd.f32 %v1955_v16, %v1233_v15 }
 0x54d   : > { %v1321_v20 = vpop.f32.mrf.mxu0 }
 0x54e   : > { %v1341_v21 = vadd.f32 %v1471_v17, %v1331_v19  ;;  %v1330_v22 = vadd.f32 %v1321_v20, %v1228_v18 }
 0x550   : > { %v1343_v23 = vadd.f32 %v1341_v21, %v2428_v39  ;;  %v1340_v24 = vadd.f32 %v1471_v17, %v1330_v22 }
 0x552   : > { %1345 = vst [vmem:[%s271_s8 + $0x8] sm:$0xff] %v1343_v23  ;;  %v1342_v25 = vadd.f32 %v1340_v24, %v2431_v41 }
 0x554   : > { %1344 = vst [vmem:[%s271_s8] sm:$0xff] %v1342_v25 }
 0x555   : > { %2129 = shalt.err (!%p2126_p3)
}
 0x556   : > { %s2130_s10 = scalar_lea.hbm %s2458_s11, 256  ;;  %s2134_s28 = scalar_lea.hbm %s2507_s5, 512 }
 0x557   : > { %p2131_p11 = scmp.ne.s32.totalorder %s2458_s11, %s2130_s10  ;;  %p2135_p4 = scmp.lt.s32.totalorder %s2458_s11, %s2507_s5 }
 0x558   : > { %p2136_p6 = scmp.lt.s32.totalorder %s2134_s28, %s2130_s10 }
 0x559   : > { %p2132_p9 = pnand %p2131_p11, %p2524_p2 }
 0x55a   : > { %p2137_p8 = por %p2136_p6, %p2135_p4 }
 0x55b   : > { %p2133_p1 = pneg %p2132_p9 }
 0x55d   : > { %p2138_p10 = pnand %p2137_p8, %p2133_p1 }
 0x55f   : > { %2141 = shalt.err (!%p2138_p10)
}
 0x560   : > { %s2195_s24 = smov 128   ;;  %s2196_s26 = smov 8  }
 0x561   : > { %1966 = dma.vmem_to_hbm [thread:$0]  (%p2524_p2), %s2453_s16, 256, %s2458_s11, %s1347_s14, %s2195_s24, %s2195_s24, %s2196_s26  }
 0x562 PF: > { %s1375_s15 = sand.u32 1, %s2172_s18   ;;  %p2525_p7 = scmp.ne.s32.totalorder %s2514_s25, 0 }
 0x563   : > { %p2526_p12 = scmp.ge.s32.totalorder %s2184_s21, 2  ;;  %s1376_s13 = scalar_lea.sflag [#allocation5], %s1375_s15 }
 0x565   : > { %p1980_p13 = pnand %p2526_p12, %p2525_p7 }
 0x567   : > { %p1981_p0 = pneg %p1980_p13 }
 0x569   : > { %2167 = dma.done.wait (%p1981_p0), %s1376_s13, 256  }
 0x56a   : > { %2169 = vsyncadd (%p1981_p0), %s1376_s13, 4294967040  ;;  %p19_p5 = scmp.ge.s32.totalorder %s2309_s23, 4   ;;  %s2527_s18 = smov %s2176_s19 }
 0x56b   : > { %s2528_s19 = smov %s2180_s20  ;;  %s2529_s20 = smov %s2318_s30 }
 0x56c   : > { %s2530_s21 = smov %s2309_s23  ;;  %21 = sbr.rel (!%p19_p5) target bundleno = 6 (0x6), region = 107 }
 0x571   :  { %1381 = vsyncpa [#allocation4], 1 }
 0x572   :  { %1383 = vsyncpa [#allocation4 + $0x1], 1 }
 0x573   :  { %1384 = vsyncpa [#allocation7], 1 }
 0x574   :  { %1385 = vsyncpa [#allocation5], 1 }
 0x575   :  { %1387 = vsyncpa [#allocation5 + $0x1], 1 }

</bundles_post_ra>
